<compile_context>
chip_gen: v7x
topology: tpu7x:2x2x1
jax: 0.10.0
libtpu: 0.0.40
codegen_flags: <defaults>
</compile_context>

<pallas_src>
import functools

import jax
import jax.numpy as jnp
import numpy as np
from jax.experimental import pallas as pl
from jax.experimental.pallas import tpu as pltpu


def _attention_kernel(x_ref, fc1w_ref, fc1b_ref, fc2wT_ref, fc2bT_ref,
                      eT_ref, mask_ref, beff_ref, out_ref, *, shifts):
    """One batch element per grid step.

    x_ref    : (1, C, P)  input, spatial dims flattened to P = H*W (lane axis)
    fc1w_ref : (C, C4)    SE fc1 weight (in, out)
    fc1b_ref : (1, C4)    SE fc1 bias (row)
    fc2wT_ref: (C, C4)    SE fc2 weight transposed to (out, in)
    fc2bT_ref: (C, 1)     SE fc2 bias (column)
    eT_ref   : (C, 25)    folded 5x5 C->1 conv taps, one column per tap
    mask_ref : (25, 1, P) per-tap edge-validity masks (0/1)
    beff_ref : (1,)       folded scalar bias (SMEM)
    out_ref  : (1, 1, P)  spatial attention map (broadcast over C outside)
    """
    x = x_ref[0]                                               # (C, P)

    # ---- squeeze-excite channel weights: VPU mul + tiny reduces (no MXU) ----
    avg = jnp.mean(x, axis=1, keepdims=True)                   # (C, 1)
    h = jnp.sum(fc1w_ref[...] * avg, axis=0, keepdims=True) + fc1b_ref[...]   # (1, C4)
    cw = jax.nn.sigmoid(
        jnp.sum(fc2wT_ref[...] * h, axis=1, keepdims=True) + fc2bT_ref[...])  # (C, 1)

    # ---- fold data-dependent channel weights into the 25 tap columns once ----
    e_eff = eT_ref[...] * cw                                   # (C, 25)

    # ---- folded 5x5 conv: XLU rolls + masks on the lane-dense flat axis ----
    # acc[p] = sum_t mask[t, p] * sum_c x[c, p + off_t] * e_eff[c, t]
    acc = jnp.zeros((1, x.shape[1]), jnp.float32)
    for t, sh in enumerate(shifts):
        rolled = x if sh == 0 else pltpu.roll(x, shift=sh, axis=1)
        contrib = jnp.sum(rolled * e_eff[:, t:t + 1], axis=0, keepdims=True)  # (1, P)
        if t == 12:                      # center tap: mask is identically 1
            acc = acc + contrib
        else:
            acc = acc + contrib * mask_ref[t]
    out_ref[0] = jax.nn.sigmoid(acc + beff_ref[0])


def attention_module(x_nchw, params):
    """Pallas implementation of AttentionModule.forward.  Input/output NCHW."""
    (fc1_w, fc1_b, fc2_w, fc2_b, c1_w, c1_b, c2_w, c2_b,
     c3_w, c3_b, cs_w, cs_b, mix) = params

    N, C, H, W = x_nchw.shape
    P = H * W
    C4 = fc1_w.shape[1]
    x = x_nchw.astype(jnp.float32).reshape(N, C, P)     # lane-dense spatial axis

    # ---- fold mix + conv1/2/3 + 1x1 conv_spatial into one 5x5 C->1 conv ----
    with jax.default_matmul_precision("highest"):
        w = mix.reshape(3).astype(jnp.float32)
        denom = w[0] + w[1] + w[2] + 1e-6
        e1 = (c1_w @ cs_w)[:, 0]                 # (C,)       1x1 contribution
        e2 = (c2_w @ cs_w)[..., 0]               # (3, 3, C)  3x3 contribution
        e3 = (c3_w @ cs_w)[..., 0]               # (5, 5, C)  5x5 contribution
        e = (w[2] / denom) * e3
        e = e.at[1:4, 1:4, :].add((w[1] / denom) * e2)
        e = e.at[2, 2, :].add((w[0] / denom) * e1)
        e_T = jnp.transpose(e.reshape(25, C)).astype(jnp.float32)   # (C, 25)

        b_eff = ((w[0] * (c1_b @ cs_w) + w[1] * (c2_b @ cs_w)
                  + w[2] * (c3_b @ cs_w)) / denom + cs_b)
        b_eff = b_eff.reshape(1).astype(jnp.float32)

    # ---- static per-tap lane shifts + edge-validity masks (host constants) ----
    yy, xx = np.meshgrid(np.arange(H), np.arange(W), indexing="ij")
    shifts = []
    masks = np.zeros((25, 1, P), np.float32)
    for dy in range(5):
        for dx in range(5):
            t = dy * 5 + dx
            oy, ox = dy - 2, dx - 2
            shifts.append(int((-(oy * W + ox)) % P))
            valid = ((yy + oy >= 0) & (yy + oy < H) &
                     (xx + ox >= 0) & (xx + ox < W))
            masks[t, 0, :] = valid.astype(np.float32).reshape(P)
    masks = jnp.asarray(masks)

    kernel = functools.partial(_attention_kernel, shifts=tuple(shifts))

    # TODO(synk): for production shapes (large C*H*W) add an H-tile grid axis
    # (2-row halo) and set vmem_limit_bytes so the per-step working set stays
    # within v7x's 64 MiB VMEM; at the shapes used here everything fits easily.
    sa = pl.pallas_call(
        kernel,
        out_shape=jax.ShapeDtypeStruct((N, 1, P), jnp.float32),
        grid=(N,),
        in_specs=[
            pl.BlockSpec((1, C, P), lambda n: (n, 0, 0)),
            pl.BlockSpec((C, C4), lambda n: (0, 0)),
            pl.BlockSpec((1, C4), lambda n: (0, 0)),
            pl.BlockSpec((C, C4), lambda n: (0, 0)),
            pl.BlockSpec((C, 1), lambda n: (0, 0)),
            pl.BlockSpec((C, 25), lambda n: (0, 0)),
            pl.BlockSpec((25, 1, P), lambda n: (0, 0, 0)),
            pl.BlockSpec(memory_space=pltpu.MemorySpace.SMEM),
        ],
        out_specs=pl.BlockSpec((1, 1, P), lambda n: (n, 0, 0)),
        compiler_params=pltpu.CompilerParams(
            dimension_semantics=("parallel",)),
    )(x,
      fc1_w.astype(jnp.float32),
      fc1_b.astype(jnp.float32),
      jnp.transpose(fc2_w).astype(jnp.float32),
      fc2_b.reshape(C, 1).astype(jnp.float32),
      e_T, masks, b_eff)

    # torch `expand_as`: broadcast the 1-channel map over C outside the kernel
    sa = sa.reshape(N, 1, H, W)
    return jnp.broadcast_to(sa, (N, C, H, W))


def init_params(key, C):
    """Deterministic synthetic parameters (shapes from the torch module)."""
    C4 = max(C // 4, 1)
    ks = jax.random.split(key, 6)
    s = 0.1
    fc1_w = jax.random.normal(ks[0], (C, C4), jnp.float32) * s   # (in, out)
    fc1_b = jnp.zeros((1, C4), jnp.float32)
    fc2_w = jax.random.normal(ks[1], (C4, C), jnp.float32) * s
    fc2_b = jnp.zeros((1, C), jnp.float32)
    c1_w = jax.random.normal(ks[2], (C, C), jnp.float32) * s     # 1x1, (in, out)
    c1_b = jnp.full((1, C), 0.01, jnp.float32)
    c2_w = jax.random.normal(ks[3], (3, 3, C, C), jnp.float32) * s  # (kh,kw,in,out)
    c2_b = jnp.full((1, C), 0.02, jnp.float32)
    c3_w = jax.random.normal(ks[4], (5, 5, C, C), jnp.float32) * s
    c3_b = jnp.full((1, C), 0.03, jnp.float32)
    cs_w = jax.random.normal(ks[5], (C, 1), jnp.float32) * s     # 1x1, C -> 1
    cs_b = jnp.zeros((1, 1), jnp.float32)
    mix = jnp.ones((1, 3), jnp.float32)                          # torch.ones(3)
    return (fc1_w, fc1_b, fc2_w, fc2_b, c1_w, c1_b, c2_w, c2_b,
            c3_w, c3_b, cs_w, cs_b, mix)


def reference(x_nchw, params):
    """Plain-JAX reference matching the torch forward (for sanity check)."""
    (fc1_w, fc1_b, fc2_w, fc2_b, c1_w, c1_b, c2_w, c2_b,
     c3_w, c3_b, cs_w, cs_b, mix) = params
    N, C, H, W = x_nchw.shape
    with jax.default_matmul_precision("highest"):
        x = jnp.transpose(x_nchw, (0, 2, 3, 1)).astype(jnp.float32)     # NHWC

        avg = jnp.mean(x, axis=(1, 2))                                  # (N, C)
        h = avg @ fc1_w + fc1_b
        h = h @ fc2_w + fc2_b
        cw = jax.nn.sigmoid(h)
        xs = x * cw[:, None, None, :]

        dn = ('NHWC', 'HWIO', 'NHWC')
        conv = lambda inp, wgt: jax.lax.conv_general_dilated(
            inp, wgt, (1, 1), 'SAME', dimension_numbers=dn)
        f1 = conv(xs, c1_w.reshape(1, 1, C, C)) + c1_b.reshape(1, 1, 1, C)
        f2 = conv(xs, c2_w) + c2_b.reshape(1, 1, 1, C)
        f3 = conv(xs, c3_w) + c3_b.reshape(1, 1, 1, C)

        wm = mix[0]
        combined = (wm[0] * f1 + wm[1] * f2 + wm[2] * f3) / (jnp.sum(wm) + 1e-6)
        sa = jax.nn.sigmoid(conv(combined, cs_w.reshape(1, 1, C, 1))
                            + cs_b.reshape(1, 1, 1, 1))
        sa = jnp.broadcast_to(sa, x.shape)
        return jnp.transpose(sa, (0, 3, 1, 2))


if __name__ == "__main__":
    key = jax.random.PRNGKey(0)
    kx, kp = jax.random.split(key)
    N, C, H, W = 2, 4, 16, 16
    x = jax.random.normal(kx, (N, C, H, W), jnp.float32)
    params = init_params(kp, C)

    out = attention_module(x, params)
    out = jax.block_until_ready(out)
    assert out.shape == (N, C, H, W)

    ref = reference(x, params)
    # Folding mix/conv_spatial/cw into the tap table changes f32 accumulation
    # order slightly, so use a marginally relaxed (still tight) tolerance.
    np.testing.assert_allclose(np.asarray(out), np.asarray(ref),
                               atol=2e-5, rtol=2e-5)
    print("KERNEL_OK")
</pallas_src>

<mosaic_0001>
module attributes {stable_mosaic.version = 11 : i64} {
  func.func @_attention_kernel(%arg0: i32, %arg1: memref<1x4x256xf32, #tpu.memory_space<vmem>>, %arg2: memref<4x1xf32, #tpu.memory_space<vmem>>, %arg3: memref<1x1xf32, #tpu.memory_space<vmem>>, %arg4: memref<4x1xf32, #tpu.memory_space<vmem>>, %arg5: memref<4x1xf32, #tpu.memory_space<vmem>>, %arg6: memref<4x25xf32, #tpu.memory_space<vmem>>, %arg7: memref<25x1x256xf32, #tpu.memory_space<vmem>>, %arg8: memref<1xf32, #tpu.memory_space<smem>>, %arg9: memref<1x1x256xf32, #tpu.memory_space<vmem>>) attributes {dimension_semantics = [#tpu.dimension_semantics<parallel>], iteration_bounds = array<i64: 2>, scalar_prefetch = 0 : i64, scratch_operands = 0 : i64, tpu.core_type = #tpu.core_type<tc>, window_params = [{transform_indices = @transform_0, window_bounds = array<i64: 1, 4, 256>}, {pipeline_mode = #tpu.pipeline_mode<synchronous>, transform_indices = @transform_1, window_bounds = array<i64: 4, 1>}, {pipeline_mode = #tpu.pipeline_mode<synchronous>, transform_indices = @transform_2, window_bounds = array<i64: 1, 1>}, {pipeline_mode = #tpu.pipeline_mode<synchronous>, transform_indices = @transform_3, window_bounds = array<i64: 4, 1>}, {pipeline_mode = #tpu.pipeline_mode<synchronous>, transform_indices = @transform_4, window_bounds = array<i64: 4, 1>}, {pipeline_mode = #tpu.pipeline_mode<synchronous>, transform_indices = @transform_5, window_bounds = array<i64: 4, 25>}, {pipeline_mode = #tpu.pipeline_mode<synchronous>, transform_indices = @transform_6, window_bounds = array<i64: 25, 1, 256>}, {transform_indices = @transform_7, window_bounds = array<i64: 1>}, {transform_indices = @transform_8, window_bounds = array<i64: 1, 1, 256>}]} {
    %c0 = arith.constant 0 : index
    %c0_0 = arith.constant 0 : index
    %c0_1 = arith.constant 0 : index
    %0 = vector.load %arg1[%c0, %c0_0, %c0_1] : memref<1x4x256xf32, #tpu.memory_space<vmem>>, vector<1x4x256xf32>
    %1 = vector.shape_cast %0 : vector<1x4x256xf32> to vector<4x256xf32>
    %cst = arith.constant dense<0.000000e+00> : vector<4xf32>
    %2 = vector.multi_reduction <add>, %1, %cst [1] : vector<4x256xf32> to vector<4xf32>
    %3 = vector.shape_cast %2 : vector<4xf32> to vector<4x1xf32>
    %cst_2 = arith.constant 2.560000e+02 : f32
    %4 = vector.broadcast %cst_2 : f32 to vector<4x1xf32>
    %5 = arith.divf %3, %4 : vector<4x1xf32>
    %c0_3 = arith.constant 0 : index
    %c0_4 = arith.constant 0 : index
    %6 = vector.load %arg2[%c0_3, %c0_4] : memref<4x1xf32, #tpu.memory_space<vmem>>, vector<4x1xf32>
    %7 = arith.mulf %6, %5 : vector<4x1xf32>
    %cst_5 = arith.constant dense<0.000000e+00> : vector<1xf32>
    %8 = vector.multi_reduction <add>, %7, %cst_5 [0] : vector<4x1xf32> to vector<1xf32>
    %9 = vector.shape_cast %8 : vector<1xf32> to vector<1x1xf32>
    %c0_6 = arith.constant 0 : index
    %c0_7 = arith.constant 0 : index
    %10 = vector.load %arg3[%c0_6, %c0_7] : memref<1x1xf32, #tpu.memory_space<vmem>>, vector<1x1xf32>
    %11 = arith.addf %9, %10 : vector<1x1xf32>
    %c0_8 = arith.constant 0 : index
    %c0_9 = arith.constant 0 : index
    %12 = vector.load %arg4[%c0_8, %c0_9] : memref<4x1xf32, #tpu.memory_space<vmem>>, vector<4x1xf32>
    %13 = vector.broadcast %11 : vector<1x1xf32> to vector<4x1xf32>
    %14 = arith.mulf %12, %13 : vector<4x1xf32>
    %cst_10 = arith.constant dense<0.000000e+00> : vector<4xf32>
    %15 = vector.multi_reduction <add>, %14, %cst_10 [1] : vector<4x1xf32> to vector<4xf32>
    %16 = vector.shape_cast %15 : vector<4xf32> to vector<4x1xf32>
    %c0_11 = arith.constant 0 : index
    %c0_12 = arith.constant 0 : index
    %17 = vector.load %arg5[%c0_11, %c0_12] : memref<4x1xf32, #tpu.memory_space<vmem>>, vector<4x1xf32>
    %18 = arith.addf %16, %17 : vector<4x1xf32>
    %19 = arith.negf %18 : vector<4x1xf32>
    %20 = math.exp %19 : vector<4x1xf32>
    %cst_13 = arith.constant 1.000000e+00 : f32
    %21 = vector.broadcast %cst_13 : f32 to vector<4x1xf32>
    %22 = arith.addf %21, %20 : vector<4x1xf32>
    %23 = arith.divf %21, %22 : vector<4x1xf32>
    %c0_14 = arith.constant 0 : index
    %c0_15 = arith.constant 0 : index
    %24 = vector.load %arg6[%c0_14, %c0_15] : memref<4x25xf32, #tpu.memory_space<vmem>>, vector<4x25xf32>
    %25 = vector.broadcast %23 : vector<4x1xf32> to vector<4x25xf32>
    %26 = arith.mulf %24, %25 : vector<4x25xf32>
    %cst_16 = arith.constant 0.000000e+00 : f32
    %27 = vector.broadcast %cst_16 : f32 to vector<1x256xf32>
    %c34_i32 = arith.constant 34 : i32
    %28 = tpu.dynamic_rotate %1 by %c34_i32 dim 1 : vector<4x256xf32>, i32 -> vector<4x256xf32>
    %29 = vector.extract_strided_slice %26 {offsets = [0, 0], sizes = [4, 1], strides = [1, 1]} : vector<4x25xf32> to vector<4x1xf32>
    %30 = vector.broadcast %29 : vector<4x1xf32> to vector<4x256xf32>
    %31 = arith.mulf %28, %30 : vector<4x256xf32>
    %cst_17 = arith.constant dense<0.000000e+00> : vector<256xf32>
    %32 = vector.multi_reduction <add>, %31, %cst_17 [0] : vector<4x256xf32> to vector<256xf32>
    %33 = vector.shape_cast %32 : vector<256xf32> to vector<1x256xf32>
    %c0_18 = arith.constant 0 : index
    %c0_19 = arith.constant 0 : index
    %c0_20 = arith.constant 0 : index
    %34 = vector.load %arg7[%c0_18, %c0_19, %c0_20] : memref<25x1x256xf32, #tpu.memory_space<vmem>>, vector<1x1x256xf32>
    %35 = vector.shape_cast %34 : vector<1x1x256xf32> to vector<1x256xf32>
    %36 = arith.mulf %33, %35 : vector<1x256xf32>
    %37 = arith.addf %27, %36 : vector<1x256xf32>
    %c33_i32 = arith.constant 33 : i32
    %38 = tpu.dynamic_rotate %1 by %c33_i32 dim 1 : vector<4x256xf32>, i32 -> vector<4x256xf32>
    %39 = vector.extract_strided_slice %26 {offsets = [0, 1], sizes = [4, 1], strides = [1, 1]} : vector<4x25xf32> to vector<4x1xf32>
    %40 = vector.broadcast %39 : vector<4x1xf32> to vector<4x256xf32>
    %41 = arith.mulf %38, %40 : vector<4x256xf32>
    %cst_21 = arith.constant dense<0.000000e+00> : vector<256xf32>
    %42 = vector.multi_reduction <add>, %41, %cst_21 [0] : vector<4x256xf32> to vector<256xf32>
    %43 = vector.shape_cast %42 : vector<256xf32> to vector<1x256xf32>
    %c1 = arith.constant 1 : index
    %c0_22 = arith.constant 0 : index
    %c0_23 = arith.constant 0 : index
    %44 = vector.load %arg7[%c1, %c0_22, %c0_23] : memref<25x1x256xf32, #tpu.memory_space<vmem>>, vector<1x1x256xf32>
    %45 = vector.shape_cast %44 : vector<1x1x256xf32> to vector<1x256xf32>
    %46 = arith.mulf %43, %45 : vector<1x256xf32>
    %47 = arith.addf %37, %46 : vector<1x256xf32>
    %c32_i32 = arith.constant 32 : i32
    %48 = tpu.dynamic_rotate %1 by %c32_i32 dim 1 : vector<4x256xf32>, i32 -> vector<4x256xf32>
    %49 = vector.extract_strided_slice %26 {offsets = [0, 2], sizes = [4, 1], strides = [1, 1]} : vector<4x25xf32> to vector<4x1xf32>
    %50 = vector.broadcast %49 : vector<4x1xf32> to vector<4x256xf32>
    %51 = arith.mulf %48, %50 : vector<4x256xf32>
    %cst_24 = arith.constant dense<0.000000e+00> : vector<256xf32>
    %52 = vector.multi_reduction <add>, %51, %cst_24 [0] : vector<4x256xf32> to vector<256xf32>
    %53 = vector.shape_cast %52 : vector<256xf32> to vector<1x256xf32>
    %c2 = arith.constant 2 : index
    %c0_25 = arith.constant 0 : index
    %c0_26 = arith.constant 0 : index
    %54 = vector.load %arg7[%c2, %c0_25, %c0_26] : memref<25x1x256xf32, #tpu.memory_space<vmem>>, vector<1x1x256xf32>
    %55 = vector.shape_cast %54 : vector<1x1x256xf32> to vector<1x256xf32>
    %56 = arith.mulf %53, %55 : vector<1x256xf32>
    %57 = arith.addf %47, %56 : vector<1x256xf32>
    %c31_i32 = arith.constant 31 : i32
    %58 = tpu.dynamic_rotate %1 by %c31_i32 dim 1 : vector<4x256xf32>, i32 -> vector<4x256xf32>
    %59 = vector.extract_strided_slice %26 {offsets = [0, 3], sizes = [4, 1], strides = [1, 1]} : vector<4x25xf32> to vector<4x1xf32>
    %60 = vector.broadcast %59 : vector<4x1xf32> to vector<4x256xf32>
    %61 = arith.mulf %58, %60 : vector<4x256xf32>
    %cst_27 = arith.constant dense<0.000000e+00> : vector<256xf32>
    %62 = vector.multi_reduction <add>, %61, %cst_27 [0] : vector<4x256xf32> to vector<256xf32>
    %63 = vector.shape_cast %62 : vector<256xf32> to vector<1x256xf32>
    %c3 = arith.constant 3 : index
    %c0_28 = arith.constant 0 : index
    %c0_29 = arith.constant 0 : index
    %64 = vector.load %arg7[%c3, %c0_28, %c0_29] : memref<25x1x256xf32, #tpu.memory_space<vmem>>, vector<1x1x256xf32>
    %65 = vector.shape_cast %64 : vector<1x1x256xf32> to vector<1x256xf32>
    %66 = arith.mulf %63, %65 : vector<1x256xf32>
    %67 = arith.addf %57, %66 : vector<1x256xf32>
    %c30_i32 = arith.constant 30 : i32
    %68 = tpu.dynamic_rotate %1 by %c30_i32 dim 1 : vector<4x256xf32>, i32 -> vector<4x256xf32>
    %69 = vector.extract_strided_slice %26 {offsets = [0, 4], sizes = [4, 1], strides = [1, 1]} : vector<4x25xf32> to vector<4x1xf32>
    %70 = vector.broadcast %69 : vector<4x1xf32> to vector<4x256xf32>
    %71 = arith.mulf %68, %70 : vector<4x256xf32>
    %cst_30 = arith.constant dense<0.000000e+00> : vector<256xf32>
    %72 = vector.multi_reduction <add>, %71, %cst_30 [0] : vector<4x256xf32> to vector<256xf32>
    %73 = vector.shape_cast %72 : vector<256xf32> to vector<1x256xf32>
    %c4 = arith.constant 4 : index
    %c0_31 = arith.constant 0 : index
    %c0_32 = arith.constant 0 : index
    %74 = vector.load %arg7[%c4, %c0_31, %c0_32] : memref<25x1x256xf32, #tpu.memory_space<vmem>>, vector<1x1x256xf32>
    %75 = vector.shape_cast %74 : vector<1x1x256xf32> to vector<1x256xf32>
    %76 = arith.mulf %73, %75 : vector<1x256xf32>
    %77 = arith.addf %67, %76 : vector<1x256xf32>
    %c18_i32 = arith.constant 18 : i32
    %78 = tpu.dynamic_rotate %1 by %c18_i32 dim 1 : vector<4x256xf32>, i32 -> vector<4x256xf32>
    %79 = vector.extract_strided_slice %26 {offsets = [0, 5], sizes = [4, 1], strides = [1, 1]} : vector<4x25xf32> to vector<4x1xf32>
    %80 = vector.broadcast %79 : vector<4x1xf32> to vector<4x256xf32>
    %81 = arith.mulf %78, %80 : vector<4x256xf32>
    %cst_33 = arith.constant dense<0.000000e+00> : vector<256xf32>
    %82 = vector.multi_reduction <add>, %81, %cst_33 [0] : vector<4x256xf32> to vector<256xf32>
    %83 = vector.shape_cast %82 : vector<256xf32> to vector<1x256xf32>
    %c5 = arith.constant 5 : index
    %c0_34 = arith.constant 0 : index
    %c0_35 = arith.constant 0 : index
    %84 = vector.load %arg7[%c5, %c0_34, %c0_35] : memref<25x1x256xf32, #tpu.memory_space<vmem>>, vector<1x1x256xf32>
    %85 = vector.shape_cast %84 : vector<1x1x256xf32> to vector<1x256xf32>
    %86 = arith.mulf %83, %85 : vector<1x256xf32>
    %87 = arith.addf %77, %86 : vector<1x256xf32>
    %c17_i32 = arith.constant 17 : i32
    %88 = tpu.dynamic_rotate %1 by %c17_i32 dim 1 : vector<4x256xf32>, i32 -> vector<4x256xf32>
    %89 = vector.extract_strided_slice %26 {offsets = [0, 6], sizes = [4, 1], strides = [1, 1]} : vector<4x25xf32> to vector<4x1xf32>
    %90 = vector.broadcast %89 : vector<4x1xf32> to vector<4x256xf32>
    %91 = arith.mulf %88, %90 : vector<4x256xf32>
    %cst_36 = arith.constant dense<0.000000e+00> : vector<256xf32>
    %92 = vector.multi_reduction <add>, %91, %cst_36 [0] : vector<4x256xf32> to vector<256xf32>
    %93 = vector.shape_cast %92 : vector<256xf32> to vector<1x256xf32>
    %c6 = arith.constant 6 : index
    %c0_37 = arith.constant 0 : index
    %c0_38 = arith.constant 0 : index
    %94 = vector.load %arg7[%c6, %c0_37, %c0_38] : memref<25x1x256xf32, #tpu.memory_space<vmem>>, vector<1x1x256xf32>
    %95 = vector.shape_cast %94 : vector<1x1x256xf32> to vector<1x256xf32>
    %96 = arith.mulf %93, %95 : vector<1x256xf32>
    %97 = arith.addf %87, %96 : vector<1x256xf32>
    %c16_i32 = arith.constant 16 : i32
    %98 = tpu.dynamic_rotate %1 by %c16_i32 dim 1 : vector<4x256xf32>, i32 -> vector<4x256xf32>
    %99 = vector.extract_strided_slice %26 {offsets = [0, 7], sizes = [4, 1], strides = [1, 1]} : vector<4x25xf32> to vector<4x1xf32>
    %100 = vector.broadcast %99 : vector<4x1xf32> to vector<4x256xf32>
    %101 = arith.mulf %98, %100 : vector<4x256xf32>
    %cst_39 = arith.constant dense<0.000000e+00> : vector<256xf32>
    %102 = vector.multi_reduction <add>, %101, %cst_39 [0] : vector<4x256xf32> to vector<256xf32>
    %103 = vector.shape_cast %102 : vector<256xf32> to vector<1x256xf32>
    %c7 = arith.constant 7 : index
    %c0_40 = arith.constant 0 : index
    %c0_41 = arith.constant 0 : index
    %104 = vector.load %arg7[%c7, %c0_40, %c0_41] : memref<25x1x256xf32, #tpu.memory_space<vmem>>, vector<1x1x256xf32>
    %105 = vector.shape_cast %104 : vector<1x1x256xf32> to vector<1x256xf32>
    %106 = arith.mulf %103, %105 : vector<1x256xf32>
    %107 = arith.addf %97, %106 : vector<1x256xf32>
    %c15_i32 = arith.constant 15 : i32
    %108 = tpu.dynamic_rotate %1 by %c15_i32 dim 1 : vector<4x256xf32>, i32 -> vector<4x256xf32>
    %109 = vector.extract_strided_slice %26 {offsets = [0, 8], sizes = [4, 1], strides = [1, 1]} : vector<4x25xf32> to vector<4x1xf32>
    %110 = vector.broadcast %109 : vector<4x1xf32> to vector<4x256xf32>
    %111 = arith.mulf %108, %110 : vector<4x256xf32>
    %cst_42 = arith.constant dense<0.000000e+00> : vector<256xf32>
    %112 = vector.multi_reduction <add>, %111, %cst_42 [0] : vector<4x256xf32> to vector<256xf32>
    %113 = vector.shape_cast %112 : vector<256xf32> to vector<1x256xf32>
    %c8 = arith.constant 8 : index
    %c0_43 = arith.constant 0 : index
    %c0_44 = arith.constant 0 : index
    %114 = vector.load %arg7[%c8, %c0_43, %c0_44] : memref<25x1x256xf32, #tpu.memory_space<vmem>>, vector<1x1x256xf32>
    %115 = vector.shape_cast %114 : vector<1x1x256xf32> to vector<1x256xf32>
    %116 = arith.mulf %113, %115 : vector<1x256xf32>
    %117 = arith.addf %107, %116 : vector<1x256xf32>
    %c14_i32 = arith.constant 14 : i32
    %118 = tpu.dynamic_rotate %1 by %c14_i32 dim 1 : vector<4x256xf32>, i32 -> vector<4x256xf32>
    %119 = vector.extract_strided_slice %26 {offsets = [0, 9], sizes = [4, 1], strides = [1, 1]} : vector<4x25xf32> to vector<4x1xf32>
    %120 = vector.broadcast %119 : vector<4x1xf32> to vector<4x256xf32>
    %121 = arith.mulf %118, %120 : vector<4x256xf32>
    %cst_45 = arith.constant dense<0.000000e+00> : vector<256xf32>
    %122 = vector.multi_reduction <add>, %121, %cst_45 [0] : vector<4x256xf32> to vector<256xf32>
    %123 = vector.shape_cast %122 : vector<256xf32> to vector<1x256xf32>
    %c9 = arith.constant 9 : index
    %c0_46 = arith.constant 0 : index
    %c0_47 = arith.constant 0 : index
    %124 = vector.load %arg7[%c9, %c0_46, %c0_47] : memref<25x1x256xf32, #tpu.memory_space<vmem>>, vector<1x1x256xf32>
    %125 = vector.shape_cast %124 : vector<1x1x256xf32> to vector<1x256xf32>
    %126 = arith.mulf %123, %125 : vector<1x256xf32>
    %127 = arith.addf %117, %126 : vector<1x256xf32>
    %c2_i32 = arith.constant 2 : i32
    %128 = tpu.dynamic_rotate %1 by %c2_i32 dim 1 : vector<4x256xf32>, i32 -> vector<4x256xf32>
    %129 = vector.extract_strided_slice %26 {offsets = [0, 10], sizes = [4, 1], strides = [1, 1]} : vector<4x25xf32> to vector<4x1xf32>
    %130 = vector.broadcast %129 : vector<4x1xf32> to vector<4x256xf32>
    %131 = arith.mulf %128, %130 : vector<4x256xf32>
    %cst_48 = arith.constant dense<0.000000e+00> : vector<256xf32>
    %132 = vector.multi_reduction <add>, %131, %cst_48 [0] : vector<4x256xf32> to vector<256xf32>
    %133 = vector.shape_cast %132 : vector<256xf32> to vector<1x256xf32>
    %c10 = arith.constant 10 : index
    %c0_49 = arith.constant 0 : index
    %c0_50 = arith.constant 0 : index
    %134 = vector.load %arg7[%c10, %c0_49, %c0_50] : memref<25x1x256xf32, #tpu.memory_space<vmem>>, vector<1x1x256xf32>
    %135 = vector.shape_cast %134 : vector<1x1x256xf32> to vector<1x256xf32>
    %136 = arith.mulf %133, %135 : vector<1x256xf32>
    %137 = arith.addf %127, %136 : vector<1x256xf32>
    %c1_i32 = arith.constant 1 : i32
    %138 = tpu.dynamic_rotate %1 by %c1_i32 dim 1 : vector<4x256xf32>, i32 -> vector<4x256xf32>
    %139 = vector.extract_strided_slice %26 {offsets = [0, 11], sizes = [4, 1], strides = [1, 1]} : vector<4x25xf32> to vector<4x1xf32>
    %140 = vector.broadcast %139 : vector<4x1xf32> to vector<4x256xf32>
    %141 = arith.mulf %138, %140 : vector<4x256xf32>
    %cst_51 = arith.constant dense<0.000000e+00> : vector<256xf32>
    %142 = vector.multi_reduction <add>, %141, %cst_51 [0] : vector<4x256xf32> to vector<256xf32>
    %143 = vector.shape_cast %142 : vector<256xf32> to vector<1x256xf32>
    %c11 = arith.constant 11 : index
    %c0_52 = arith.constant 0 : index
    %c0_53 = arith.constant 0 : index
    %144 = vector.load %arg7[%c11, %c0_52, %c0_53] : memref<25x1x256xf32, #tpu.memory_space<vmem>>, vector<1x1x256xf32>
    %145 = vector.shape_cast %144 : vector<1x1x256xf32> to vector<1x256xf32>
    %146 = arith.mulf %143, %145 : vector<1x256xf32>
    %147 = arith.addf %137, %146 : vector<1x256xf32>
    %148 = vector.extract_strided_slice %26 {offsets = [0, 12], sizes = [4, 1], strides = [1, 1]} : vector<4x25xf32> to vector<4x1xf32>
    %149 = vector.broadcast %148 : vector<4x1xf32> to vector<4x256xf32>
    %150 = arith.mulf %1, %149 : vector<4x256xf32>
    %cst_54 = arith.constant dense<0.000000e+00> : vector<256xf32>
    %151 = vector.multi_reduction <add>, %150, %cst_54 [0] : vector<4x256xf32> to vector<256xf32>
    %152 = vector.shape_cast %151 : vector<256xf32> to vector<1x256xf32>
    %153 = arith.addf %147, %152 : vector<1x256xf32>
    %c255_i32 = arith.constant 255 : i32
    %154 = tpu.dynamic_rotate %1 by %c255_i32 dim 1 : vector<4x256xf32>, i32 -> vector<4x256xf32>
    %155 = vector.extract_strided_slice %26 {offsets = [0, 13], sizes = [4, 1], strides = [1, 1]} : vector<4x25xf32> to vector<4x1xf32>
    %156 = vector.broadcast %155 : vector<4x1xf32> to vector<4x256xf32>
    %157 = arith.mulf %154, %156 : vector<4x256xf32>
    %cst_55 = arith.constant dense<0.000000e+00> : vector<256xf32>
    %158 = vector.multi_reduction <add>, %157, %cst_55 [0] : vector<4x256xf32> to vector<256xf32>
    %159 = vector.shape_cast %158 : vector<256xf32> to vector<1x256xf32>
    %c13 = arith.constant 13 : index
    %c0_56 = arith.constant 0 : index
    %c0_57 = arith.constant 0 : index
    %160 = vector.load %arg7[%c13, %c0_56, %c0_57] : memref<25x1x256xf32, #tpu.memory_space<vmem>>, vector<1x1x256xf32>
    %161 = vector.shape_cast %160 : vector<1x1x256xf32> to vector<1x256xf32>
    %162 = arith.mulf %159, %161 : vector<1x256xf32>
    %163 = arith.addf %153, %162 : vector<1x256xf32>
    %c254_i32 = arith.constant 254 : i32
    %164 = tpu.dynamic_rotate %1 by %c254_i32 dim 1 : vector<4x256xf32>, i32 -> vector<4x256xf32>
    %165 = vector.extract_strided_slice %26 {offsets = [0, 14], sizes = [4, 1], strides = [1, 1]} : vector<4x25xf32> to vector<4x1xf32>
    %166 = vector.broadcast %165 : vector<4x1xf32> to vector<4x256xf32>
    %167 = arith.mulf %164, %166 : vector<4x256xf32>
    %cst_58 = arith.constant dense<0.000000e+00> : vector<256xf32>
    %168 = vector.multi_reduction <add>, %167, %cst_58 [0] : vector<4x256xf32> to vector<256xf32>
    %169 = vector.shape_cast %168 : vector<256xf32> to vector<1x256xf32>
    %c14 = arith.constant 14 : index
    %c0_59 = arith.constant 0 : index
    %c0_60 = arith.constant 0 : index
    %170 = vector.load %arg7[%c14, %c0_59, %c0_60] : memref<25x1x256xf32, #tpu.memory_space<vmem>>, vector<1x1x256xf32>
    %171 = vector.shape_cast %170 : vector<1x1x256xf32> to vector<1x256xf32>
    %172 = arith.mulf %169, %171 : vector<1x256xf32>
    %173 = arith.addf %163, %172 : vector<1x256xf32>
    %c242_i32 = arith.constant 242 : i32
    %174 = tpu.dynamic_rotate %1 by %c242_i32 dim 1 : vector<4x256xf32>, i32 -> vector<4x256xf32>
    %175 = vector.extract_strided_slice %26 {offsets = [0, 15], sizes = [4, 1], strides = [1, 1]} : vector<4x25xf32> to vector<4x1xf32>
    %176 = vector.broadcast %175 : vector<4x1xf32> to vector<4x256xf32>
    %177 = arith.mulf %174, %176 : vector<4x256xf32>
    %cst_61 = arith.constant dense<0.000000e+00> : vector<256xf32>
    %178 = vector.multi_reduction <add>, %177, %cst_61 [0] : vector<4x256xf32> to vector<256xf32>
    %179 = vector.shape_cast %178 : vector<256xf32> to vector<1x256xf32>
    %c15 = arith.constant 15 : index
    %c0_62 = arith.constant 0 : index
    %c0_63 = arith.constant 0 : index
    %180 = vector.load %arg7[%c15, %c0_62, %c0_63] : memref<25x1x256xf32, #tpu.memory_space<vmem>>, vector<1x1x256xf32>
    %181 = vector.shape_cast %180 : vector<1x1x256xf32> to vector<1x256xf32>
    %182 = arith.mulf %179, %181 : vector<1x256xf32>
    %183 = arith.addf %173, %182 : vector<1x256xf32>
    %c241_i32 = arith.constant 241 : i32
    %184 = tpu.dynamic_rotate %1 by %c241_i32 dim 1 : vector<4x256xf32>, i32 -> vector<4x256xf32>
    %185 = vector.extract_strided_slice %26 {offsets = [0, 16], sizes = [4, 1], strides = [1, 1]} : vector<4x25xf32> to vector<4x1xf32>
    %186 = vector.broadcast %185 : vector<4x1xf32> to vector<4x256xf32>
    %187 = arith.mulf %184, %186 : vector<4x256xf32>
    %cst_64 = arith.constant dense<0.000000e+00> : vector<256xf32>
    %188 = vector.multi_reduction <add>, %187, %cst_64 [0] : vector<4x256xf32> to vector<256xf32>
    %189 = vector.shape_cast %188 : vector<256xf32> to vector<1x256xf32>
    %c16 = arith.constant 16 : index
    %c0_65 = arith.constant 0 : index
    %c0_66 = arith.constant 0 : index
    %190 = vector.load %arg7[%c16, %c0_65, %c0_66] : memref<25x1x256xf32, #tpu.memory_space<vmem>>, vector<1x1x256xf32>
    %191 = vector.shape_cast %190 : vector<1x1x256xf32> to vector<1x256xf32>
    %192 = arith.mulf %189, %191 : vector<1x256xf32>
    %193 = arith.addf %183, %192 : vector<1x256xf32>
    %c240_i32 = arith.constant 240 : i32
    %194 = tpu.dynamic_rotate %1 by %c240_i32 dim 1 : vector<4x256xf32>, i32 -> vector<4x256xf32>
    %195 = vector.extract_strided_slice %26 {offsets = [0, 17], sizes = [4, 1], strides = [1, 1]} : vector<4x25xf32> to vector<4x1xf32>
    %196 = vector.broadcast %195 : vector<4x1xf32> to vector<4x256xf32>
    %197 = arith.mulf %194, %196 : vector<4x256xf32>
    %cst_67 = arith.constant dense<0.000000e+00> : vector<256xf32>
    %198 = vector.multi_reduction <add>, %197, %cst_67 [0] : vector<4x256xf32> to vector<256xf32>
    %199 = vector.shape_cast %198 : vector<256xf32> to vector<1x256xf32>
    %c17 = arith.constant 17 : index
    %c0_68 = arith.constant 0 : index
    %c0_69 = arith.constant 0 : index
    %200 = vector.load %arg7[%c17, %c0_68, %c0_69] : memref<25x1x256xf32, #tpu.memory_space<vmem>>, vector<1x1x256xf32>
    %201 = vector.shape_cast %200 : vector<1x1x256xf32> to vector<1x256xf32>
    %202 = arith.mulf %199, %201 : vector<1x256xf32>
    %203 = arith.addf %193, %202 : vector<1x256xf32>
    %c239_i32 = arith.constant 239 : i32
    %204 = tpu.dynamic_rotate %1 by %c239_i32 dim 1 : vector<4x256xf32>, i32 -> vector<4x256xf32>
    %205 = vector.extract_strided_slice %26 {offsets = [0, 18], sizes = [4, 1], strides = [1, 1]} : vector<4x25xf32> to vector<4x1xf32>
    %206 = vector.broadcast %205 : vector<4x1xf32> to vector<4x256xf32>
    %207 = arith.mulf %204, %206 : vector<4x256xf32>
    %cst_70 = arith.constant dense<0.000000e+00> : vector<256xf32>
    %208 = vector.multi_reduction <add>, %207, %cst_70 [0] : vector<4x256xf32> to vector<256xf32>
    %209 = vector.shape_cast %208 : vector<256xf32> to vector<1x256xf32>
    %c18 = arith.constant 18 : index
    %c0_71 = arith.constant 0 : index
    %c0_72 = arith.constant 0 : index
    %210 = vector.load %arg7[%c18, %c0_71, %c0_72] : memref<25x1x256xf32, #tpu.memory_space<vmem>>, vector<1x1x256xf32>
    %211 = vector.shape_cast %210 : vector<1x1x256xf32> to vector<1x256xf32>
    %212 = arith.mulf %209, %211 : vector<1x256xf32>
    %213 = arith.addf %203, %212 : vector<1x256xf32>
    %c238_i32 = arith.constant 238 : i32
    %214 = tpu.dynamic_rotate %1 by %c238_i32 dim 1 : vector<4x256xf32>, i32 -> vector<4x256xf32>
    %215 = vector.extract_strided_slice %26 {offsets = [0, 19], sizes = [4, 1], strides = [1, 1]} : vector<4x25xf32> to vector<4x1xf32>
    %216 = vector.broadcast %215 : vector<4x1xf32> to vector<4x256xf32>
    %217 = arith.mulf %214, %216 : vector<4x256xf32>
    %cst_73 = arith.constant dense<0.000000e+00> : vector<256xf32>
    %218 = vector.multi_reduction <add>, %217, %cst_73 [0] : vector<4x256xf32> to vector<256xf32>
    %219 = vector.shape_cast %218 : vector<256xf32> to vector<1x256xf32>
    %c19 = arith.constant 19 : index
    %c0_74 = arith.constant 0 : index
    %c0_75 = arith.constant 0 : index
    %220 = vector.load %arg7[%c19, %c0_74, %c0_75] : memref<25x1x256xf32, #tpu.memory_space<vmem>>, vector<1x1x256xf32>
    %221 = vector.shape_cast %220 : vector<1x1x256xf32> to vector<1x256xf32>
    %222 = arith.mulf %219, %221 : vector<1x256xf32>
    %223 = arith.addf %213, %222 : vector<1x256xf32>
    %c226_i32 = arith.constant 226 : i32
    %224 = tpu.dynamic_rotate %1 by %c226_i32 dim 1 : vector<4x256xf32>, i32 -> vector<4x256xf32>
    %225 = vector.extract_strided_slice %26 {offsets = [0, 20], sizes = [4, 1], strides = [1, 1]} : vector<4x25xf32> to vector<4x1xf32>
    %226 = vector.broadcast %225 : vector<4x1xf32> to vector<4x256xf32>
    %227 = arith.mulf %224, %226 : vector<4x256xf32>
    %cst_76 = arith.constant dense<0.000000e+00> : vector<256xf32>
    %228 = vector.multi_reduction <add>, %227, %cst_76 [0] : vector<4x256xf32> to vector<256xf32>
    %229 = vector.shape_cast %228 : vector<256xf32> to vector<1x256xf32>
    %c20 = arith.constant 20 : index
    %c0_77 = arith.constant 0 : index
    %c0_78 = arith.constant 0 : index
    %230 = vector.load %arg7[%c20, %c0_77, %c0_78] : memref<25x1x256xf32, #tpu.memory_space<vmem>>, vector<1x1x256xf32>
    %231 = vector.shape_cast %230 : vector<1x1x256xf32> to vector<1x256xf32>
    %232 = arith.mulf %229, %231 : vector<1x256xf32>
    %233 = arith.addf %223, %232 : vector<1x256xf32>
    %c225_i32 = arith.constant 225 : i32
    %234 = tpu.dynamic_rotate %1 by %c225_i32 dim 1 : vector<4x256xf32>, i32 -> vector<4x256xf32>
    %235 = vector.extract_strided_slice %26 {offsets = [0, 21], sizes = [4, 1], strides = [1, 1]} : vector<4x25xf32> to vector<4x1xf32>
    %236 = vector.broadcast %235 : vector<4x1xf32> to vector<4x256xf32>
    %237 = arith.mulf %234, %236 : vector<4x256xf32>
    %cst_79 = arith.constant dense<0.000000e+00> : vector<256xf32>
    %238 = vector.multi_reduction <add>, %237, %cst_79 [0] : vector<4x256xf32> to vector<256xf32>
    %239 = vector.shape_cast %238 : vector<256xf32> to vector<1x256xf32>
    %c21 = arith.constant 21 : index
    %c0_80 = arith.constant 0 : index
    %c0_81 = arith.constant 0 : index
    %240 = vector.load %arg7[%c21, %c0_80, %c0_81] : memref<25x1x256xf32, #tpu.memory_space<vmem>>, vector<1x1x256xf32>
    %241 = vector.shape_cast %240 : vector<1x1x256xf32> to vector<1x256xf32>
    %242 = arith.mulf %239, %241 : vector<1x256xf32>
    %243 = arith.addf %233, %242 : vector<1x256xf32>
    %c224_i32 = arith.constant 224 : i32
    %244 = tpu.dynamic_rotate %1 by %c224_i32 dim 1 : vector<4x256xf32>, i32 -> vector<4x256xf32>
    %245 = vector.extract_strided_slice %26 {offsets = [0, 22], sizes = [4, 1], strides = [1, 1]} : vector<4x25xf32> to vector<4x1xf32>
    %246 = vector.broadcast %245 : vector<4x1xf32> to vector<4x256xf32>
    %247 = arith.mulf %244, %246 : vector<4x256xf32>
    %cst_82 = arith.constant dense<0.000000e+00> : vector<256xf32>
    %248 = vector.multi_reduction <add>, %247, %cst_82 [0] : vector<4x256xf32> to vector<256xf32>
    %249 = vector.shape_cast %248 : vector<256xf32> to vector<1x256xf32>
    %c22 = arith.constant 22 : index
    %c0_83 = arith.constant 0 : index
    %c0_84 = arith.constant 0 : index
    %250 = vector.load %arg7[%c22, %c0_83, %c0_84] : memref<25x1x256xf32, #tpu.memory_space<vmem>>, vector<1x1x256xf32>
    %251 = vector.shape_cast %250 : vector<1x1x256xf32> to vector<1x256xf32>
    %252 = arith.mulf %249, %251 : vector<1x256xf32>
    %253 = arith.addf %243, %252 : vector<1x256xf32>
    %c223_i32 = arith.constant 223 : i32
    %254 = tpu.dynamic_rotate %1 by %c223_i32 dim 1 : vector<4x256xf32>, i32 -> vector<4x256xf32>
    %255 = vector.extract_strided_slice %26 {offsets = [0, 23], sizes = [4, 1], strides = [1, 1]} : vector<4x25xf32> to vector<4x1xf32>
    %256 = vector.broadcast %255 : vector<4x1xf32> to vector<4x256xf32>
    %257 = arith.mulf %254, %256 : vector<4x256xf32>
    %cst_85 = arith.constant dense<0.000000e+00> : vector<256xf32>
    %258 = vector.multi_reduction <add>, %257, %cst_85 [0] : vector<4x256xf32> to vector<256xf32>
    %259 = vector.shape_cast %258 : vector<256xf32> to vector<1x256xf32>
    %c23 = arith.constant 23 : index
    %c0_86 = arith.constant 0 : index
    %c0_87 = arith.constant 0 : index
    %260 = vector.load %arg7[%c23, %c0_86, %c0_87] : memref<25x1x256xf32, #tpu.memory_space<vmem>>, vector<1x1x256xf32>
    %261 = vector.shape_cast %260 : vector<1x1x256xf32> to vector<1x256xf32>
    %262 = arith.mulf %259, %261 : vector<1x256xf32>
    %263 = arith.addf %253, %262 : vector<1x256xf32>
    %c222_i32 = arith.constant 222 : i32
    %264 = tpu.dynamic_rotate %1 by %c222_i32 dim 1 : vector<4x256xf32>, i32 -> vector<4x256xf32>
    %265 = vector.extract_strided_slice %26 {offsets = [0, 24], sizes = [4, 1], strides = [1, 1]} : vector<4x25xf32> to vector<4x1xf32>
    %266 = vector.broadcast %265 : vector<4x1xf32> to vector<4x256xf32>
    %267 = arith.mulf %264, %266 : vector<4x256xf32>
    %cst_88 = arith.constant dense<0.000000e+00> : vector<256xf32>
    %268 = vector.multi_reduction <add>, %267, %cst_88 [0] : vector<4x256xf32> to vector<256xf32>
    %269 = vector.shape_cast %268 : vector<256xf32> to vector<1x256xf32>
    %c24 = arith.constant 24 : index
    %c0_89 = arith.constant 0 : index
    %c0_90 = arith.constant 0 : index
    %270 = vector.load %arg7[%c24, %c0_89, %c0_90] : memref<25x1x256xf32, #tpu.memory_space<vmem>>, vector<1x1x256xf32>
    %271 = vector.shape_cast %270 : vector<1x1x256xf32> to vector<1x256xf32>
    %272 = arith.mulf %269, %271 : vector<1x256xf32>
    %273 = arith.addf %263, %272 : vector<1x256xf32>
    %c0_91 = arith.constant 0 : index
    %274 = memref.load %arg8[%c0_91] : memref<1xf32, #tpu.memory_space<smem>>
    %275 = vector.broadcast %274 : f32 to vector<1x256xf32>
    %276 = arith.addf %273, %275 : vector<1x256xf32>
    %277 = arith.negf %276 : vector<1x256xf32>
    %278 = math.exp %277 : vector<1x256xf32>
    %cst_92 = arith.constant 1.000000e+00 : f32
    %279 = vector.broadcast %cst_92 : f32 to vector<1x256xf32>
    %280 = arith.addf %279, %278 : vector<1x256xf32>
    %281 = arith.divf %279, %280 : vector<1x256xf32>
    %c0_93 = arith.constant 0 : index
    %c0_94 = arith.constant 0 : index
    %c0_95 = arith.constant 0 : index
    %282 = vector.load %arg9[%c0_93, %c0_94, %c0_95] : memref<1x1x256xf32, #tpu.memory_space<vmem>>, vector<1x1x256xf32>
    %283 = vector.shape_cast %282 : vector<1x1x256xf32> to vector<1x256xf32>
    %284 = vector.shape_cast %281 : vector<1x256xf32> to vector<1x1x256xf32>
    tpu.vector_store %arg9[%c0_93, %c0_94, %c0_95], %284 {strides = array<i32>} : memref<1x1x256xf32, #tpu.memory_space<vmem>>, vector<1x1x256xf32>,
    return
  }
  func.func @transform_0(%arg0: i32) -> (i32, i32, i32) {
    %c0_i32 = arith.constant 0 : i32
    %c0_i32_0 = arith.constant 0 : i32
    %c0_i32_1 = arith.constant 0 : i32
    return %arg0, %c0_i32, %c0_i32_0 : i32, i32, i32
  }
  func.func @transform_1(%arg0: i32) -> (i32, i32) {
    %c0_i32 = arith.constant 0 : i32
    %c0_i32_0 = arith.constant 0 : i32
    %c0_i32_1 = arith.constant 0 : i32
    return %c0_i32, %c0_i32_0 : i32, i32
  }
  func.func @transform_2(%arg0: i32) -> (i32, i32) {
    %c0_i32 = arith.constant 0 : i32
    %c0_i32_0 = arith.constant 0 : i32
    %c0_i32_1 = arith.constant 0 : i32
    return %c0_i32, %c0_i32_0 : i32, i32
  }
  func.func @transform_3(%arg0: i32) -> (i32, i32) {
    %c0_i32 = arith.constant 0 : i32
    %c0_i32_0 = arith.constant 0 : i32
    %c0_i32_1 = arith.constant 0 : i32
    return %c0_i32, %c0_i32_0 : i32, i32
  }
  func.func @transform_4(%arg0: i32) -> (i32, i32) {
    %c0_i32 = arith.constant 0 : i32
    %c0_i32_0 = arith.constant 0 : i32
    %c0_i32_1 = arith.constant 0 : i32
    return %c0_i32, %c0_i32_0 : i32, i32
  }
  func.func @transform_5(%arg0: i32) -> (i32, i32) {
    %c0_i32 = arith.constant 0 : i32
    %c0_i32_0 = arith.constant 0 : i32
    %c0_i32_1 = arith.constant 0 : i32
    return %c0_i32, %c0_i32_0 : i32, i32
  }
  func.func @transform_6(%arg0: i32) -> (i32, i32, i32) {
    %c0_i32 = arith.constant 0 : i32
    %c0_i32_0 = arith.constant 0 : i32
    %c0_i32_1 = arith.constant 0 : i32
    %c0_i32_2 = arith.constant 0 : i32
    return %c0_i32, %c0_i32_0, %c0_i32_1 : i32, i32, i32
  }
  func.func @transform_7(%arg0: i32) -> i32 {
    %c0_i32 = arith.constant 0 : i32
    %c0_i32_0 = arith.constant 0 : i32
    return %c0_i32 : i32
  }
  func.func @transform_8(%arg0: i32) -> (i32, i32, i32) {
    %c0_i32 = arith.constant 0 : i32
    %c0_i32_0 = arith.constant 0 : i32
    %c0_i32_1 = arith.constant 0 : i32
    return %arg0, %c0_i32, %c0_i32_0 : i32, i32, i32
  }
}

</mosaic_0001>

<bundles_post_ra>
// kernel: tpu_custom_call.1
= control target key start
LH: loop header
LB: loop body
LE: loop exit
PB: predicated region body
PF: predicated region fallthrough
CT: control target
= control target key end

     0   :  { %s2752_s0 = inlined_call_operand.vmem [shape: f32[2,4,256], index: 0, kind: input, shape index: {}]   ;;  %s2753_s1 = inlined_call_operand.vmem [shape: f32[4,1], index: 1, kind: input, shape index: {}]   ;;  %s2754_s2 = inlined_call_operand.<no memory space> [shape: f32[1,1], index: 2, kind: input, shape index: {}]   ;;  %s2755_s3 = inlined_call_operand.vmem [shape: f32[4,1], index: 3, kind: input, shape index: {}]   ;;  %s2756_s4 = inlined_call_operand.vmem [shape: f32[4,1], index: 4, kind: input, shape index: {}]   ;;  %s2757_s5 = inlined_call_operand.vmem [shape: f32[4,25], index: 5, kind: input, shape index: {}]   ;;  %s2758_s6 = inlined_call_operand.hbm [shape: f32[25,1,256], index: 6, kind: input, shape index: {}]   ;;  %s2759_s7 = inlined_call_operand.<no memory space> [shape: f32[1], index: 7, kind: input, shape index: {}]   ;;  %s2760_s8 = inlined_call_operand.hbm [shape: f32[2,1,256], index: 8, kind: output, shape index: {}]  }
   0x1   :  { %v13_v0 = vstv %s2754_s2  ;;  %15 = sst [smem:[#allocation3]] %s2759_s7 }
   0x2   :  { %14 = vst [vmem:[#allocation2] sm:$0x1] %v13_v0 }
   0x3   :  { %16 = vsyncpa [#allocation5], 0 }
   0x4   :  { %17 = vsyncpa [#allocation6], 0 }
   0x5   :  { %19 = vsyncpa [#allocation6 + $0x1], 0  ;;  %s1946_s9 = smov 0   ;;  %s1948_s10 = smov 0  }
   0x6   :  { %s1950_s11 = smov 0   ;;  %s1952_s12 = smov 0  }
   0x7 LB: > { %s1967_s2 = sadd.s32 4294967295, %s1838_s12   ;;  %s1582_s7 = sadd.s32 4294967294, %s1838_s12   ;;  %s1838_s12 = sphi %s1952_s12, %s2896_s12   ;;  %s1834_s11 = sphi %s1950_s11, %s2895_s11   ;;  %s1830_s10 = sphi %s1948_s10, %s2894_s10   ;;  %s1826_s9 = sphi %s1946_s9, %s2893_s9  }
   0x8   : > { %s1971_s13 = sadd.s32 1, %s1838_s12   ;;  %s205_s14 = sadd.s32 1, %s1834_s11 }
   0x9   : > { %s202_s15 = ssub.s32 %s1838_s12, %s1971_s13  ;;  %p215_p0 = scmp.ne.s32.totalorder %s1834_s11, %s1830_s10 }
   0xa   : > { %p203_p1 = scmp.eq.s32.totalorder %s202_s15, 0  ;;  %p216_p2 = scmp.eq.s32.totalorder %s1967_s2, 1 }
   0xb   : > { %p221_p3 = scmp.ne.s32.totalorder %s1830_s10, %s1826_s9  ;;  %p222_p4 = scmp.eq.s32.totalorder %s1582_s7, 1 }
   0xc   : > { %s1982_s16 = scalar_select %p203_p1, %s1834_s11, %s205_s14  }
   0xd   : > { %p1984_p5 = por %p216_p2, %p215_p0  ;;  %p1988_p6 = por %p222_p4, %p221_p3 }
   0xe   : > { %p1583_p7 = scmp.ge.s32.totalorder %s1838_s12, 1  ;;  %p229_p8 = scmp.lt.s32.totalorder %s1838_s12, 3 }
   0xf   : > { %s2793_s17 = scalar_select %p1984_p5, 1, 0 }
  0x10   : > { %s2794_s18 = scalar_select %p1988_p6, 1, 0 }
  0x11   : > { %p2761_p9 = scmp.eq.s32.totalorder %s1967_s2, 0  ;;  %p1995_p10 = pnand %p1583_p7, %p229_p8 }
  0x12   : > { %s1840_s20 = smov [#allocation4]   ;;  %s1744_s25 = scalar_lea.hbm %s2758_s6, 800 }
  0x13   : > { %s2795_s19 = scalar_select %p1995_p10, 1, 0 }
  0x14   : > { %s256_s21 = sshll.u32 %s1840_s20, 4  ;;  %p1607_p11 = pneg %p1995_p10  ;;  %s257_s21 = int_to_ptr.vmem [resolvable:$true] %s256_s21 }
  0x15   : > { %p1745_p13 = scmp.ne.s32.totalorder %s2758_s6, %s1744_s25  ;;  %p1751_p3 = scmp.lt.u32.totalorder %s1744_s25, %s2758_s6 }
  0x16   : > { %p2003_p12 = pnand %p2761_p9, %p1607_p11 }
  0x18   : > { %p1746_p0 = pneg %p2003_p12 }
  0x1a   : > { %p1747_p1 = pnand %p1746_p0, %p1745_p13 }
  0x1c   : > { %p1748_p2 = pneg %p1747_p1 }
  0x1e   : > { %p1753_p4 = pnand %p1751_p3, %p1748_p2 }
  0x20   : > { %1756 = shalt.err (!%p1753_p4)
}
  0x21   : > { %s1757_s30 = scalar_lea.vmem %s257_s21, 800  ;;  %p1765_p9 = scmp.lt.s32.totalorder %s257_s21, %s257_s21 }
  0x22   : > { %p1758_p7 = scmp.ne.s32.totalorder %s257_s21, %s1757_s30  ;;  %p1766_p6 = scmp.lt.s32.totalorder %s1757_s30, %s1757_s30 }
  0x24   : > { %p1760_p8 = pnand %p1758_p7, %p1746_p0  ;;  %p1767_p5 = por %p1766_p6, %p1765_p9 }
  0x26   : > { %p1761_p11 = pneg %p1760_p8 }
  0x28   : > { %p1768_p10 = pnand %p1767_p5, %p1761_p11 }
  0x2a   : > { %1771 = shalt.err (!%p1768_p10)
}
  0x2b   : > { %s1841_s7 = smov 32   ;;  %s1842_s14 = smov 2  }
  0x2c   : > { %1610 = dma.hbm_to_vmem [thread:$0]  (!%p2003_p12), %s2758_s6, 800, %s257_s21, [#allocation5], %s1841_s7, %s1841_s7, %s1842_s14  }
  0x2d   : > { %p2797_p13 = scmp.ne.s32.totalorder %s2795_s19, 0 }
  0x2f   : > { %283 = sbr.rel (%p2797_p13) target bundleno = 716 (0x2cc), region = 52 }
  0x36   : > { %p2798_p1 = scmp.eq.s32.totalorder %s1967_s2, 0 }
  0x38   : > { %1817 = dma.done.wait (%p2798_p1), [#allocation5], 800   ;;  %p2799_p0 = pmov %p2798_p1 }
  0x39   : > { %p317_p5 = scmp.lt.s32.totalorder %s1967_s2, 1  ;;  %vm326_vm0 = vcmask 1043456   ;;  %s1843_s19 = smov 34   ;;  %v1855_v6 = vmov 0   ;;  %v2764_v9 = vlaneseq  ;;  %v334_v23 = vld [vmem:[%s2753_s1] sm:$0xf] }
  0x3a   : > { %1819 = vsyncadd (%p2799_p0), [#allocation5], 4294966496  ;;  %s1844_s21 = smov 33   ;;  %s1845_s27 = smov 32   ;;  %1704 = vset.pattern.permute.xlu0 %v1855_v6  ;;  %1705 = vset.pattern.permute.xlu1 %v1855_v6  ;;  %vm336_vm4 = vcmask 3072  }
  0x3b   : > { %s318_s23 = scalar_select %p317_p5, %s1967_s2, 1  ;;  %v2089_v10 = vand.u32 127, %v2764_v9  ;;  %v2123_v39 = vshrl.u32 %v2764_v9, 7  ;;  %v344_v43 = vld [vmem:[#allocation2] sm:$0x1] }
  0x3c   : > { %s1846_s28 = smov 31   ;;  %s1847_s29 = smov 30   ;;  %v346_v50 = vld [vmem:[%s2755_s3] sm:$0xf] }
  0x3d   : > { %s1599_s24 = sshll.u32 %s318_s23, 3  ;;  %s1848_s30 = smov 18   ;;  %2800 = vst [vmem:[#allocation10_spill] sm:$0xff] %v2089_v10  ;;  %vm418_vm1 = vcmp.lt.s32.totalorder %v2089_v10, 33  ;;  %vm462_vm2 = vcmp.lt.s32.totalorder %v2089_v10, 32  ;;  %vm506_vm3 = vcmp.lt.s32.totalorder %v2089_v10, 31 }
  0x3e   : > { %s2034_s26 = scalar_lea.vmem %s2752_s0, %s1599_s24  ;;  %s1849_s7 = smov 17   ;;  %vm550_vm5 = vcmp.lt.s32.totalorder %v2089_v10, 30  ;;  %vm594_vm6 = vcmp.lt.s32.totalorder %v2089_v10, 18  ;;  %2801 = vst [vmem:[#allocation11_spill] sm:$0xff] %v2123_v39  ;;  %vm638_vm7 = vcmp.lt.s32.totalorder %v2089_v10, 17  ;;  %v2127_v44 = vsub.s32 0, %v2123_v39 }
  0x3f   : > { %v2037_v1 = vld [vmem:[%s2034_s26] sm:$0xff]  ;;  %s1850_s14 = smov 14   ;;  %s1851_s15 = smov 16   ;;  %vm682_vm8 = vcmp.lt.s32.totalorder %v2089_v10, 16  ;;  %vm726_vm9 = vcmp.lt.s32.totalorder %v2089_v10, 15  ;;  %vm770_vm10 = vcmp.lt.s32.totalorder %v2089_v10, 14 }
  0x40   : > { %v2041_v2 = vcombine.high %v2037_v1, %v2037_v1  ;;  %v327_v3 = vsel %vm326_vm0, %v2037_v1, 0.0  ;;  %368 = vrot.lane.b32.xlu1 %v2037_v1, %s1843_s19  ;;  %s1852_s20 = smov 2   ;;  %s1853_s23 = smov 1   ;;  %v353_v53 = vld [vmem:[%s2756_s4] sm:$0xf]  ;;  %vm814_vm11 = vcmp.lt.s32.totalorder %v2089_v10, 2 }
  0x41   : > { %s1854_s24 = smov 15   ;;  %s1856_s25 = smov 127   ;;  %vm858_vm12 = vcmp.lt.s32.totalorder %v2089_v10, 1  ;;  %vm933_vm13 = vcmp.lt.s32.totalorder %v2089_v10, 127  ;;  %vm1021_vm14 = vcmp.lt.s32.totalorder %v2089_v10, 114  ;;  %vm1065_vm15 = vcmp.lt.s32.totalorder %v2089_v10, 113 }
  0x42   : > { %v328_v4 = vsel %vm326_vm0, %v2041_v2, 0.0  ;;  %s1857_s22 = smov 126   ;;  %p2891_p9 = scmp.ne.s32.totalorder %s2793_s17, 0 }
  0x43   : > { %v329_v5 = vadd.f32 %v328_v4, %v327_v3 }
  0x44   : > { %370 = vrot.lane.b32.xlu1 %v2041_v2, %s1843_s19  ;;  %s1858_s19 = smov 114  }
  0x45   : > { %330 = vadd.xlane.f32.xlu0 %v329_v5 }
  0x48   : > { %414 = vrot.lane.b32.xlu1 %v2037_v1, %s1844_s21 }
  0x4c   : > { %416 = vrot.lane.b32.xlu1 %v2041_v2, %s1844_s21  ;;  %s1859_s21 = smov 113  }
  0x50   : > { %458 = vrot.lane.b32.xlu1 %v2037_v1, %s1845_s27 }
  0x54   : > { %460 = vrot.lane.b32.xlu1 %v2041_v2, %s1845_s27  ;;  %s1860_s27 = smov 112  }
  0x58   : > { %502 = vrot.lane.b32.xlu1 %v2037_v1, %s1846_s28 }
  0x5b   : > { %546 = vrot.lane.b32.xlu0 %v2037_v1, %s1847_s29 }
  0x5c   : > { %504 = vrot.lane.b32.xlu1 %v2041_v2, %s1846_s28  ;;  %s1861_s28 = smov 111  }
  0x5f   : > { %768 = vrot.lane.b32.xlu0 %v2041_v2, %s1850_s14 }
  0x60   : > { %548 = vrot.lane.b32.xlu1 %v2041_v2, %s1847_s29  ;;  %s1862_s29 = smov 110  }
  0x63   : > { %812 = vrot.lane.b32.xlu0 %v2041_v2, %s1852_s20 }
  0x64   : > { %590 = vrot.lane.b32.xlu1 %v2037_v1, %s1848_s30 }
  0x67   : > { %854 = vrot.lane.b32.xlu0 %v2037_v1, %s1853_s23 }
  0x68   : > { %592 = vrot.lane.b32.xlu1 %v2041_v2, %s1848_s30  ;;  %s1863_s30 = smov 98  }
  0x6b   : > { %931 = vrot.lane.b32.xlu0 %v2041_v2, %s1856_s25 }
  0x6c   : > { %634 = vrot.lane.b32.xlu1 %v2037_v1, %s1849_s7 }
  0x6f   : > { %973 = vrot.lane.b32.xlu0 %v2037_v1, %s1857_s22 }
  0x70   : > { %636 = vrot.lane.b32.xlu1 %v2041_v2, %s1849_s7  ;;  %s1600_s7 = sshll.u32 %s1967_s2, 5  ;;  %s1894_s2 = smov [#allocation7]  }
  0x74   : > { %678 = vrot.lane.b32.xlu1 %v2037_v1, %s1851_s15 }
  0x78   : > { %680 = vrot.lane.b32.xlu1 %v2041_v2, %s1851_s15 }
  0x7c   : > { %722 = vrot.lane.b32.xlu1 %v2037_v1, %s1854_s24 }
  0x80   : > { %724 = vrot.lane.b32.xlu1 %v2041_v2, %s1854_s24  ;;  %s2710_s24 = scalar_lea.hbm %s2760_s8, %s1600_s7 }
  0x84   : > { %766 = vrot.lane.b32.xlu1 %v2037_v1, %s1850_s14 }
  0x88   : > { %810 = vrot.lane.b32.xlu1 %v2037_v1, %s1852_s20 }
  0x8c   : > { %856 = vrot.lane.b32.xlu1 %v2041_v2, %s1853_s23 }
  0x90   : > { %929 = vrot.lane.b32.xlu1 %v2037_v1, %s1856_s25 }
  0x94   : > { %975 = vrot.lane.b32.xlu1 %v2041_v2, %s1857_s22 }
  0x98   : > { %1017 = vrot.lane.b32.xlu1 %v2037_v1, %s1858_s19 }
  0x9c   : > { %1019 = vrot.lane.b32.xlu1 %v2041_v2, %s1858_s19  ;;  %s1877_s19 = smov 95  }
  0xa0   : > { %1061 = vrot.lane.b32.xlu1 %v2037_v1, %s1859_s21 }
  0xa4   : > { %1063 = vrot.lane.b32.xlu1 %v2041_v2, %s1859_s21  ;;  %s1885_s21 = smov 97  }
  0xa8   : > { %1105 = vrot.lane.b32.xlu1 %v2037_v1, %s1860_s27 }
  0xac   : > { %1107 = vrot.lane.b32.xlu1 %v2041_v2, %s1860_s27  ;;  %s1887_s27 = smov 96  }
  0xb0   : > { %1149 = vrot.lane.b32.xlu1 %v2037_v1, %s1861_s28 }
  0xb2   : > { %v2082_v7 = vpop.permute.xlu1 %368 }
  0xb4   : > { %1151 = vrot.lane.b32.xlu1 %v2041_v2, %s1861_s28  ;;  %s1891_s28 = smov 94  }
  0xb6   : > { %v2085_v8 = vpop.permute.xlu1 %370 }
  0xb8   : > { %1193 = vrot.lane.b32.xlu1 %v2037_v1, %s1862_s29 }
  0xba   : > { %v415_v11 = vpop.permute.xlu1 %414 }
  0xbc   : > { %1195 = vrot.lane.b32.xlu1 %v2041_v2, %s1862_s29  ;;  %s314_s29 = sand.u32 1, %s1830_s10  }
  0xbd   : > { %s1497_s25 = scalar_lea.sflag [#allocation6], %s314_s29 }
  0xbe   : > { %v417_v12 = vpop.permute.xlu1 %416 }
  0xbf   : > { %v2093_v13 = vsel %vm418_vm1, %v415_v11, %v417_v12  ;;  %v2095_v14 = vsel %vm418_vm1, %v417_v12, %v415_v11  ;;  %vm1109_vm1 = vcmp.lt.s32.totalorder %v2089_v10, 112 }
  0xc0   : > { %1237 = vrot.lane.b32.xlu1 %v2037_v1, %s1863_s30 }
  0xc2   : > { %v459_v15 = vpop.permute.xlu1 %458 }
  0xc6   : > { %v461_v16 = vpop.permute.xlu1 %460 }
  0xc7   : > { %v2100_v17 = vsel %vm462_vm2, %v459_v15, %v461_v16  ;;  %v2102_v18 = vsel %vm462_vm2, %v461_v16, %v459_v15  ;;  %vm1153_vm2 = vcmp.lt.s32.totalorder %v2089_v10, 111 }
  0xca   : > { %v503_v19 = vpop.permute.xlu1 %502 }
  0xce   : > { %v505_v20 = vpop.permute.xlu1 %504 }
  0xcf   : > { %v2105_v21 = vsel %vm506_vm3, %v503_v19, %v505_v20  ;;  %v2107_v22 = vsel %vm506_vm3, %v505_v20, %v503_v19  ;;  %vm374_vm3 = vcmp.lt.s32.totalorder %v2089_v10, 34 }
  0xd2   : > { %v331_v24 = vpop.xlane.xlu0 %330  ;;  %v549_v25 = vpop.permute.xlu1 %548 }
  0xd3   : > { %v333_v26 = vmul.f32 0.00390625, %v331_v24 }
  0xd5   : > { %v335_v27 = vmul.f32 %v334_v23, %v333_v26 }
  0xd6   : > { %v591_v28 = vpop.permute.xlu1 %590  ;;  %v547_v29 = vpop.permute.xlu0 %546 }
  0xd7   : > { %v337_v30 = vsel %vm336_vm4, %v335_v27, 0.0  ;;  %v2113_v31 = vsel %vm550_vm5, %v547_v29, %v549_v25  ;;  %v2115_v32 = vsel %vm550_vm5, %v549_v25, %v547_v29  ;;  %vm977_vm4 = vcmp.lt.s32.totalorder %v2089_v10, 126 }
  0xd8   : > { %v338_v33 = vrot.slane %v337_v30, 4  ;;  %vm1197_vm5 = vcmp.lt.s32.totalorder %v2089_v10, 110 }
  0xda   : > { %v339_v34 = vadd.f32 %v338_v33, %v337_v30  ;;  %v593_v35 = vpop.permute.xlu1 %592  ;;  %v769_v61 = vpop.permute.xlu0 %768  ;;  %v1864_v33 = vmov 4  }
  0xdb   : > { %v2118_v36 = vsel %vm594_vm6, %v591_v28, %v593_v35  ;;  %v2120_v37 = vsel %vm594_vm6, %v593_v35, %v591_v28 }
  0xdc   : > { %v340_v38 = vrot.slane %v339_v34, 2 }
  0xde   : > { %v341_v40 = vadd.f32 %v340_v38, %v339_v34  ;;  %v635_v41 = vpop.permute.xlu1 %634  ;;  %v813_v3 = vpop.permute.xlu0 %812 }
  0xe0   : > { %v342_v42 = vrot.slane %v341_v40, 1 }
  0xe2   : > { %v343_v45 = vadd.f32 %v342_v42, %v341_v40  ;;  %v637_v46 = vpop.permute.xlu1 %636  ;;  %v855_v16 = vpop.permute.xlu0 %854 }
  0xe3   : > { %v2129_v47 = vsel %vm638_vm7, %v635_v41, %v637_v46  ;;  %v2131_v48 = vsel %vm638_vm7, %v637_v46, %v635_v41 }
  0xe4   : > { %v345_v49 = vadd.f32 %v344_v43, %v343_v45 }
  0xe6   : > { %v350_v51 = vrot.slane %v345_v49, %v2127_v44  ;;  %v679_v52 = vpop.permute.xlu1 %678  ;;  %v932_v26 = vpop.permute.xlu0 %931 }
  0xe8   : > { %v351_v54 = vmul.f32 %v350_v51, %v346_v50 }
  0xea   : > { %v354_v55 = vadd.f32 %v353_v53, %v351_v54  ;;  %v681_v56 = vpop.permute.xlu1 %680 }
  0xeb   : > { %v2141_v57 = vsel %vm682_vm8, %v679_v52, %v681_v56  ;;  %v2143_v58 = vsel %vm682_vm8, %v681_v56, %v679_v52 }
  0xec   : > { %v1591_v59 = vmul.f32 -1.442695, %v354_v55 }
  0xee   : > { %1731 = vpow2.f32 %v1591_v59  ;;  %v723_v60 = vpop.permute.xlu1 %722  ;;  %v2192_v59 = vpop.permute.xlu0 %973 }
  0xf2   : > { %v725_v62 = vpop.permute.xlu1 %724 }
  0xf3   : > { %v2146_v63 = vsel %vm726_vm9, %v723_v60, %v725_v62  ;;  %v2148_v0 = vsel %vm726_vm9, %v725_v62, %v723_v60  ;;  %v361_v60 = vld [vmem:[%s2757_s5] sm:$0xf] }
  0xf6   : > { %v767_v4 = vpop.permute.xlu1 %766 }
  0xf7   : > { %v2151_v5 = vsel %vm770_vm10, %v767_v4, %v769_v61  ;;  %v2153_v6 = vsel %vm770_vm10, %v769_v61, %v767_v4  ;;  %v1866_v4 = vmov 1  }
  0xf8   : > { %v1732_v11 = vpop.eup %1731 }
  0xf9   : > { %v358_v12 = vadd.f32 1.0, %v1732_v11  ;;  %v1867_v11 = vmov 8  }
  0xfa   : > { %v811_v15 = vpop.permute.xlu1 %810 }
  0xfb   : > { %1733 = vrcp.f32 %v358_v12  ;;  %v2156_v19 = vsel %vm814_vm11, %v811_v15, %v813_v3  ;;  %v2158_v20 = vsel %vm814_vm11, %v813_v3, %v811_v15  ;;  %v1865_v3 = vmov 7  }
  0xfc   : > { %v1868_v12 = vmov 2   ;;  %v1869_v15 = vmov 9  }
  0xfe   : > { %v857_v23 = vpop.permute.xlu1 %856 }
  0xff   : > { %v2161_v24 = vsel %vm858_vm12, %v855_v16, %v857_v23  ;;  %v2163_v25 = vsel %vm858_vm12, %v857_v23, %v855_v16  ;;  %v1870_v16 = vmov 3   ;;  %v1871_v23 = vmov 10  }
 0x102   : > { %v930_v27 = vpop.permute.xlu1 %929 }
 0x103   : > { %v2166_v28 = vsel %vm933_vm13, %v930_v27, %v932_v26  ;;  %v2168_v29 = vsel %vm933_vm13, %v932_v26, %v930_v27  ;;  %v1872_v26 = vmov 5   ;;  %v1873_v27 = vmov 11  }
 0x104   : > { %2802 = vst [vmem:[#allocation12_spill] sm:$0xff] %v2166_v28  ;;  %2803 = vst [vmem:[#allocation13_spill] sm:$0xff] %v2168_v29 }
 0x105   : > { %v1734_v30 = vpop.eup %1733 }
 0x106   : > { %364 = vperm.xlu0 %1704, %v1734_v30   ;;  %v2170_v34 = vpop.permute.xlu1 %975  ;;  %v1874_v30 = vmov 6  }
 0x10a   : > { %1709 = vset.pattern.permute.xlu0 %v1864_v33  ;;  %v1018_v35 = vpop.permute.xlu1 %1017  ;;  %v1875_v33 = vmov 14  }
 0x10e   : > { %v1020_v38 = vpop.permute.xlu1 %1019 }
 0x10f   : > { %v2173_v40 = vsel %vm1021_vm14, %v1018_v35, %v1020_v38  ;;  %v2175_v41 = vsel %vm1021_vm14, %v1020_v38, %v1018_v35  ;;  %v1876_v35 = vmov 12   ;;  %v1878_v38 = vmov 17  }
 0x110   : > { %2804 = vst [vmem:[#allocation14_spill] sm:$0xff] %v2173_v40  ;;  %2805 = vst [vmem:[#allocation15_spill] sm:$0xff] %v2175_v41 }
 0x112   : > { %v1062_v42 = vpop.permute.xlu1 %1061 }
 0x116   : > { %v1064_v43 = vpop.permute.xlu1 %1063 }
 0x117   : > { %v2178_v45 = vsel %vm1065_vm15, %v1062_v42, %v1064_v43  ;;  %v2180_v46 = vsel %vm1065_vm15, %v1064_v43, %v1062_v42  ;;  %v1879_v42 = vmov 13   ;;  %v1880_v43 = vmov 18  }
 0x118   : > { %2806 = vst [vmem:[#allocation16_spill] sm:$0xff] %v2178_v45  ;;  %2807 = vst [vmem:[#allocation17_spill] sm:$0xff] %v2180_v46 }
 0x11a   : > { %v1106_v49 = vpop.permute.xlu1 %1105 }
 0x11e   : > { %v1108_v50 = vpop.permute.xlu1 %1107 }
 0x11f   : > { %v2183_v51 = vsel %vm1109_vm1, %v1106_v49, %v1108_v50  ;;  %v2185_v52 = vsel %vm1109_vm1, %v1108_v50, %v1106_v49  ;;  %v1881_v49 = vmov 15   ;;  %v1882_v50 = vmov 19  }
 0x122   : > { %v1150_v53 = vpop.permute.xlu1 %1149 }
 0x126   : > { %v1152_v54 = vpop.permute.xlu1 %1151 }
 0x127   : > { %v2188_v55 = vsel %vm1153_vm2, %v1150_v53, %v1152_v54  ;;  %v2190_v56 = vsel %vm1153_vm2, %v1152_v54, %v1150_v53  ;;  %v1883_v53 = vmov 16   ;;  %v1884_v54 = vmov 20  }
 0x128   : > { %2808 = vst [vmem:[#allocation18_spill] sm:$0xff] %v2188_v55  ;;  %2809 = vst [vmem:[#allocation19_spill] sm:$0xff] %v2190_v56 }
 0x185   : > { %v365_v61 = vpop.permute.xlu0 %364 }
 0x186   : > { %v2197_v62 = vmul.f32 %v365_v61, %v361_v60  ;;  %v1886_v60 = vmov 21   ;;  %v1888_v61 = vmov 22  }
 0x188   : > { %554 = vperm.xlu0 %1709, %v2197_v62   ;;  %379 = vperm.xlu1 %1705, %v2197_v62  }
 0x18c   : > { %1712 = vset.pattern.permute.xlu0 %v1865_v3  ;;  %1706 = vset.pattern.permute.xlu1 %v1866_v4  ;;  %v1889_v3 = vmov 23   ;;  %v1890_v4 = vmov 24  }
 0x18d   : > { %686 = vperm.xlu0 %1712, %v2197_v62   ;;  %422 = vperm.xlu1 %1706, %v2197_v62  }
 0x191   : > { %1713 = vset.pattern.permute.xlu0 %v1867_v11  ;;  %1707 = vset.pattern.permute.xlu1 %v1868_v12  ;;  %v1194_v11 = vpop.permute.xlu1 %1193  ;;  %v2239_v12 = vsub.s32 1, %v2123_v39 }
 0x192   : > { %730 = vperm.xlu0 %1713, %v2197_v62   ;;  %466 = vperm.xlu1 %1707, %v2197_v62  }
 0x196   : > { %1714 = vset.pattern.permute.xlu0 %v1869_v15  ;;  %1708 = vset.pattern.permute.xlu1 %v1870_v16  ;;  %v1196_v15 = vpop.permute.xlu1 %1195  ;;  %v2242_v16 = vld [vmem:[#allocation4 + $0x8] sm:$0x3] }
 0x197   : > { %774 = vperm.xlu0 %1714, %v2197_v62   ;;  %510 = vperm.xlu1 %1708, %v2197_v62  }
 0x19b   : > { %1715 = vset.pattern.permute.xlu0 %v1871_v23  ;;  %1710 = vset.pattern.permute.xlu1 %v1872_v26  ;;  %v2244_v23 = vld [vmem:[#allocation4] sm:$0x3]  ;;  %v2254_v26 = vld [vmem:[#allocation4 + $0xe] sm:$0x3] }
 0x19c   : > { %818 = vperm.xlu0 %1715, %v2197_v62   ;;  %598 = vperm.xlu1 %1710, %v2197_v62  }
 0x1a0   : > { %1716 = vset.pattern.permute.xlu0 %v1873_v27  ;;  %1711 = vset.pattern.permute.xlu1 %v1874_v30  ;;  %v2256_v27 = vld [vmem:[#allocation4 + $0x2] sm:$0x3]  ;;  %v2260_v30 = vsel %vm977_vm4, %v2170_v34, %v2192_v59 }
 0x1a1   : > { %862 = vperm.xlu0 %1716, %v2197_v62   ;;  %642 = vperm.xlu1 %1711, %v2197_v62  }
 0x1a5   : > { %1719 = vset.pattern.permute.xlu0 %v1875_v33  ;;  %1239 = vrot.lane.b32.xlu1 %v2041_v2, %s1863_s30  ;;  %v2262_v33 = vsel %vm1197_vm5, %v1194_v11, %v1196_v15  ;;  %s1588_s30 = sshll.u32 %s314_s29, 1 }
 0x1a6   : > { %981 = vperm.xlu0 %1719, %v2197_v62   ;;  %1717 = vset.pattern.permute.xlu1 %v1876_v35  ;;  %2810 = vst [vmem:[#allocation20_spill] sm:$0xff] %v2262_v33  ;;  %v2334_v35 = vld [vmem:[#allocation4 + $0x22] sm:$0x3]  ;;  %s316_s14 = scalar_lea.vmem [#allocation7], %s1588_s30 }
 0x1a7   : > { %2818 = vst [vmem:[#allocation28_spill] sm:$0xff] %v2334_v35  ;;  %s1511_s15 = sshll.u32 %s316_s14, 4  ;;  %s2712_s15 = int_to_ptr.vmem [resolvable:$true] %s1511_s15 }
 0x1a8   : > { %s1772_s22 = scalar_lea.vmem %s2712_s15, 32 }
 0x1a9   : > { %899 = vperm.xlu1 %1717, %v2197_v62   ;;  %p1773_p6 = scmp.ne.s32.totalorder %s2712_s15, %s1772_s22 }
 0x1aa   : > { %1369 = vrot.lane.b32.xlu0 %v2037_v1, %s1877_s19 }
 0x1ab   : > { %1722 = vset.pattern.permute.xlu0 %v1878_v38  ;;  %v2270_v38 = vld [vmem:[#allocation4 + $0x4] sm:$0x3]  ;;  %p1774_p10 = pnand %p1773_p6, %p2891_p9 }
 0x1ad   : > { %1718 = vset.pattern.permute.xlu1 %v1879_v42  ;;  %v2272_v42 = vsel %vm1197_vm5, %v1196_v15, %v1194_v11  ;;  %v2292_v11 = vld [vmem:[#allocation4 + $0x14] sm:$0x3]  ;;  %v2294_v15 = vld [vmem:[#allocation4 + $0xa] sm:$0x3]  ;;  %p1775_p12 = pneg %p1774_p10 }
 0x1ae   : > { %1113 = vperm.xlu0 %1722, %v2197_v62   ;;  %937 = vperm.xlu1 %1718, %v2197_v62   ;;  %2811 = vst [vmem:[#allocation21_spill] sm:$0xff] %v2272_v42  ;;  %2814 = vst [vmem:[#allocation24_spill] sm:$0xff] %v2292_v11 }
 0x1b2   : > { %1723 = vset.pattern.permute.xlu0 %v1880_v43  ;;  %1720 = vset.pattern.permute.xlu1 %v1881_v49  ;;  %v2274_v43 = vpop.permute.xlu1 %1237  ;;  %v2280_v49 = vld [vmem:[#allocation4 + $0x12] sm:$0x3] }
 0x1b3   : > { %1157 = vperm.xlu0 %1723, %v2197_v62   ;;  %1025 = vperm.xlu1 %1720, %v2197_v62   ;;  %2812 = vst [vmem:[#allocation22_spill] sm:$0xff] %v2274_v43  ;;  %2813 = vst [vmem:[#allocation23_spill] sm:$0xff] %v2280_v49  ;;  %v2324_v43 = vld [vmem:[#allocation4 + $0x1c] sm:$0x3] }
 0x1b4   : > { %2817 = vst [vmem:[#allocation27_spill] sm:$0xff] %v2324_v43 }
 0x1b7   : > { %1724 = vset.pattern.permute.xlu0 %v1882_v50  ;;  %1721 = vset.pattern.permute.xlu1 %v1883_v53  ;;  %v2282_v50 = vld [vmem:[#allocation4 + $0x6] sm:$0x3]  ;;  %v1892_v53 = vmov 839922192  }
 0x1b8   : > { %1201 = vperm.xlu0 %1724, %v2197_v62   ;;  %1069 = vperm.xlu1 %1721, %v2197_v62  }
 0x1bc   : > { %1725 = vset.pattern.permute.xlu0 %v1884_v54  ;;  %1281 = vrot.lane.b32.xlu1 %v2037_v1, %s1885_s21  ;;  %v902_v54 = vunpack.c.l.s4 %v1892_v53  ;;  %v2314_v53 = vld [vmem:[#allocation4 + $0xc] sm:$0x3] }
 0x1bd   : > { %1245 = vperm.xlu0 %1725, %v2197_v62   ;;  %2816 = vst [vmem:[#allocation26_spill] sm:$0xff] %v2314_v53 }
 0x1c0   : > { %1283 = vrot.lane.b32.xlu1 %v2041_v2, %s1885_s21 }
 0x1c1   : > { %1726 = vset.pattern.permute.xlu0 %v1886_v60 }
 0x1c2   : > { %1289 = vperm.xlu0 %1726, %v2197_v62  }
 0x1c4   : > { %1325 = vrot.lane.b32.xlu1 %v2037_v1, %s1887_s27 }
 0x1c6   : > { %1727 = vset.pattern.permute.xlu0 %v1888_v61 }
 0x1c7   : > { %1333 = vperm.xlu0 %1727, %v2197_v62  }
 0x1c8   : > { %1327 = vrot.lane.b32.xlu1 %v2041_v2, %s1887_s27 }
 0x1cb   : > { %1728 = vset.pattern.permute.xlu0 %v1889_v3  ;;  %v2312_v3 = vld [vmem:[#allocation4 + $0x16] sm:$0x3] }
 0x1cc   : > { %1377 = vperm.xlu0 %1728, %v2197_v62   ;;  %1371 = vrot.lane.b32.xlu1 %v2041_v2, %s1877_s19  ;;  %2815 = vst [vmem:[#allocation25_spill] sm:$0xff] %v2312_v3  ;;  %s1776_s19 = sshll.u32 %s1894_s2, 4  ;;  %s1777_s19 = int_to_ptr.vmem [resolvable:$false] %s1776_s19 }
 0x1cd   : > { %s1778_s21 = scalar_lea.vmem %s1777_s19, 64  ;;  %p1779_p2 = scmp.lt.s32.totalorder %s2712_s15, %s1777_s19 }
 0x1ce   : > { %p1780_p3 = scmp.lt.s32.totalorder %s1778_s21, %s1772_s22 }
 0x1d0   : > { %1729 = vset.pattern.permute.xlu0 %v1890_v4  ;;  %1415 = vrot.lane.b32.xlu1 %v2041_v2, %s1891_s28  ;;  %v375_v2 = vsel %vm374_vm3, %v2082_v7, %v2085_v8  ;;  %p1781_p4 = por %p1780_p3, %p1779_p2 }
 0x1d1   : > { %1421 = vperm.xlu0 %1729, %v2197_v62   ;;  %v2252_v62 = vsel %vm977_vm4, %v2192_v59, %v2170_v34  ;;  %v903_v34 = vunpack.c.0.s8 %v902_v54 }
 0x1d2   : > { %p1782_p7 = pnand %p1781_p4, %p1775_p12 }
 0x1d3   : > { %v2346_v54 = vsub.s32 %v903_v34, %v2123_v39 }
 0x1d5   : > { %1413 = vrot.lane.b32.xlu0 %v2037_v1, %s1891_s28  ;;  %v376_v1 = vsel %vm374_vm3, %v2085_v8, %v2082_v7  ;;  %v2268_v8 = vld [vmem:[#allocation4 + $0x10] sm:$0x3]  ;;  %v2357_v7 = vld [vmem:[#allocation4 + $0x24] sm:$0x3] }
 0x1d6   : > { %2820 = vst [vmem:[#allocation30_spill] sm:$0xff] %v2357_v7 }
 0x207   : > { %v555_v60 = vpop.permute.xlu0 %554  ;;  %v380_v59 = vpop.permute.xlu1 %379 }
 0x208   : > { %v557_v4 = vmul.f32 %v555_v60, %v2115_v32  ;;  %v558_v9 = vmul.f32 %v555_v60, %v2113_v31  ;;  %v382_v46 = vmul.f32 %v380_v59, %v376_v1  ;;  %v383_v45 = vmul.f32 %v380_v59, %v375_v2  ;;  %v2341_v59 = vld [vmem:[#allocation4 + $0x1a] sm:$0x3] }
 0x209   : > { %2819 = vst [vmem:[#allocation29_spill] sm:$0xff] %v2341_v59  ;;  %v2379_v59 = vld [vmem:[#allocation4 + $0x20] sm:$0x3] }
 0x20a   : > { %v559_v31 = vsel %vm326_vm0, %v557_v4, 0.0  ;;  %v384_v32 = vsel %vm326_vm0, %v382_v46, 0.0  ;;  %v391_v2 = vsel %vm326_vm0, %v383_v45, 0.0  ;;  %v566_v42 = vsel %vm326_vm0, %v558_v9, 0.0  ;;  %v2363_v46 = vld [vmem:[#allocation4 + $0x1e] sm:$0x3] }
 0x20b   : > { %v385_v60 = vrot.slane %v384_v32, 4  ;;  %v392_v61 = vrot.slane %v391_v2, 4  ;;  %v560_v41 = vrot.slane %v559_v31, 4  ;;  %2821 = vst [vmem:[#allocation31_spill] sm:$0xff] %v2363_v46  ;;  %v567_v56 = vrot.slane %v566_v42, 4  ;;  %2823 = vst [vmem:[#allocation33_spill] sm:$0xff] %v2379_v59 }
 0x20c   : > { %v687_v4 = vpop.permute.xlu0 %686  ;;  %v423_v33 = vpop.permute.xlu1 %422 }
 0x20d   : > { %v386_v10 = vadd.f32 %v385_v60, %v384_v32  ;;  %v393_v40 = vadd.f32 %v392_v61, %v391_v2  ;;  %v689_v9 = vmul.f32 %v687_v4, %v2143_v58  ;;  %v690_v39 = vmul.f32 %v687_v4, %v2141_v57 }
 0x20e   : > { %v425_v45 = vmul.f32 %v423_v33, %v2095_v14  ;;  %v426_v43 = vmul.f32 %v423_v33, %v2093_v13  ;;  %v2372_v14 = vld [vmem:[#allocation4 + $0x26] sm:$0x3]  ;;  %v561_v61 = vadd.f32 %v560_v41, %v559_v31  ;;  %v568_v57 = vadd.f32 %v567_v56, %v566_v42  ;;  %v2387_v41 = vld [vmem:[#allocation4 + $0x2a] sm:$0x3] }
 0x20f   : > { %v387_v1 = vrot.slane %v386_v10, 2  ;;  %v394_v35 = vrot.slane %v393_v40, 2  ;;  %v691_v32 = vsel %vm326_vm0, %v689_v9, 0.0  ;;  %2822 = vst [vmem:[#allocation32_spill] sm:$0xff] %v2372_v14  ;;  %v698_v33 = vsel %vm326_vm0, %v690_v39, 0.0 }
 0x210   : > { %v427_v2 = vsel %vm326_vm0, %v425_v45, 0.0  ;;  %v434_v58 = vsel %vm326_vm0, %v426_v43, 0.0  ;;  %v2381_v43 = vld [vmem:[#allocation4 + $0x28] sm:$0x3]  ;;  %v692_v55 = vrot.slane %v691_v32, 4  ;;  %v699_v60 = vrot.slane %v698_v33, 4 }
 0x211   : > { %v388_v13 = vadd.f32 %v387_v1, %v386_v10  ;;  %v395_v9 = vadd.f32 %v394_v35, %v393_v40  ;;  %v428_v34 = vrot.slane %v427_v2, 4  ;;  %v435_v45 = vrot.slane %v434_v58, 4  ;;  %2824 = vst [vmem:[#allocation34_spill] sm:$0xff] %v2381_v43 }
 0x212   : > { %v562_v31 = vrot.slane %v561_v61, 2  ;;  %v1314_v35 = vrot.slane %v2387_v41, %v2127_v44  ;;  %v700_v29 = vadd.f32 %v699_v60, %v698_v33 }
 0x213   : > { %v389_v1 = vrot.slane %v388_v13, 1  ;;  %v429_v7 = vadd.f32 %v428_v34, %v427_v2  ;;  %v436_v4 = vadd.f32 %v435_v45, %v434_v58  ;;  %v396_v39 = vrot.slane %v395_v9, 1  ;;  %v731_v34 = vpop.permute.xlu0 %730  ;;  %v467_v2 = vpop.permute.xlu1 %466 }
 0x214   : > { %v569_v58 = vrot.slane %v568_v57, 2  ;;  %v693_v45 = vadd.f32 %v692_v55, %v691_v32  ;;  %v733_v42 = vmul.f32 %v731_v34, %v2148_v0  ;;  %v734_v3 = vmul.f32 %v731_v34, %v2146_v63 }
 0x215   : > { %v430_v10 = vrot.slane %v429_v7, 2  ;;  %v437_v46 = vrot.slane %v436_v4, 2  ;;  %v390_v14 = vadd.f32 %v389_v1, %v388_v13  ;;  %v469_v11 = vmul.f32 %v467_v2, %v2102_v18 }
 0x216   : > { %v470_v28 = vmul.f32 %v467_v2, %v2100_v17  ;;  %v563_v49 = vadd.f32 %v562_v31, %v561_v61  ;;  %v397_v55 = vadd.f32 %v396_v39, %v395_v9  ;;  %v570_v40 = vadd.f32 %v569_v58, %v568_v57 }
 0x217   : > { %v431_v56 = vadd.f32 %v430_v10, %v429_v7  ;;  %v438_v59 = vadd.f32 %v437_v46, %v436_v4  ;;  %v735_v43 = vsel %vm326_vm0, %v733_v42, 0.0  ;;  %v471_v13 = vsel %vm326_vm0, %v469_v11, 0.0  ;;  %v2421_v42 = vld [vmem:[#allocation4 + $0x2c] sm:$0x3] }
 0x218   : > { %v478_v7 = vsel %vm326_vm0, %v470_v28, 0.0  ;;  %v694_v46 = vrot.slane %v693_v45, 2  ;;  %v701_v33 = vrot.slane %v700_v29, 2  ;;  %v2825_v18 = vrot.slane %v2244_v23, %v2127_v44 }
 0x219   : > { %v432_v32 = vrot.slane %v431_v56, 1  ;;  %v439_v53 = vrot.slane %v438_v59, 1  ;;  %v742_v17 = vsel %vm326_vm0, %v734_v3, 0.0  ;;  %v472_v61 = vrot.slane %v471_v13, 4  ;;  %v511_v3 = vpop.permute.xlu1 %510 }
 0x21a   : > { %v410_v63 = vmul.f32 %v2825_v18, %v390_v14  ;;  %v479_v4 = vrot.slane %v478_v7, 4  ;;  %v2826_v57 = vrot.slane %v2244_v23, %v2239_v12  ;;  %v2827_v11 = vrot.slane %v2256_v27, %v2127_v44 }
 0x21b   : > { %v433_v0 = vadd.f32 %v432_v32, %v431_v56  ;;  %v440_v60 = vadd.f32 %v439_v53, %v438_v59  ;;  %v2828_v10 = vrot.slane %v2256_v27, %v2239_v12  ;;  %v736_v59 = vrot.slane %v735_v43, 4  ;;  %v775_v27 = vpop.permute.xlu0 %774 }
 0x21c   : > { %v411_v9 = vmul.f32 %v2826_v57, %v397_v55  ;;  %v564_v39 = vrot.slane %v563_v49, 1  ;;  %v571_v1 = vrot.slane %v570_v40, 1  ;;  %v473_v14 = vadd.f32 %v472_v61, %v471_v13 }
 0x21d   : > { %v454_v28 = vmul.f32 %v2827_v11, %v433_v0  ;;  %v455_v53 = vmul.f32 %v2828_v10, %v440_v60  ;;  %v480_v56 = vadd.f32 %v479_v4, %v478_v7  ;;  %v743_v23 = vrot.slane %v742_v17, 4 }
 0x21e   : > { %v1318_v2 = vrot.slane %v2387_v41, %v2239_v12  ;;  %v695_v58 = vadd.f32 %v694_v46, %v693_v45  ;;  %v702_v55 = vadd.f32 %v701_v33, %v700_v29  ;;  %v474_v32 = vrot.slane %v473_v14, 2 }
 0x21f   : > { %v456_v31 = vadd.f32 %v454_v28, %v410_v63  ;;  %v457_v34 = vadd.f32 %v455_v53, %v411_v9  ;;  %v481_v0 = vrot.slane %v480_v56, 2  ;;  %v737_v60 = vadd.f32 %v736_v59, %v735_v43 }
 0x220   : > { %v513_v18 = vmul.f32 %v511_v3, %v2107_v22  ;;  %v514_v13 = vmul.f32 %v511_v3, %v2105_v21  ;;  %v1358_v7 = vrot.slane %v2421_v42, %v2127_v44  ;;  %v565_v61 = vadd.f32 %v564_v39, %v563_v49 }
 0x221   : > { %v572_v63 = vadd.f32 %v571_v1, %v570_v40  ;;  %v475_v4 = vadd.f32 %v474_v32, %v473_v14  ;;  %v482_v57 = vadd.f32 %v481_v0, %v480_v56  ;;  %v744_v9 = vadd.f32 %v743_v23, %v742_v17  ;;  %v819_v1 = vpop.permute.xlu0 %818 }
 0x222   : > { %v777_v11 = vmul.f32 %v775_v27, %v2153_v6  ;;  %v515_v29 = vsel %vm326_vm0, %v513_v18, 0.0  ;;  %v522_v45 = vsel %vm326_vm0, %v514_v13, 0.0  ;;  %v696_v46 = vrot.slane %v695_v58, 1 }
 0x223   : > { %v703_v43 = vrot.slane %v702_v55, 1  ;;  %v476_v33 = vrot.slane %v475_v4, 1  ;;  %v483_v22 = vrot.slane %v482_v57, 1  ;;  %v738_v28 = vrot.slane %v737_v60, 2 }
 0x224   : > { %v778_v21 = vmul.f32 %v775_v27, %v2151_v5  ;;  %v516_v10 = vrot.slane %v515_v29, 4  ;;  %v523_v53 = vrot.slane %v522_v45, 4  ;;  %v2829_v49 = vrot.slane %v2242_v16, %v2127_v44 }
 0x225   : > { %v2830_v6 = vrot.slane %v2242_v16, %v2239_v12  ;;  %v477_v59 = vadd.f32 %v476_v33, %v475_v4  ;;  %v484_v39 = vadd.f32 %v483_v22, %v482_v57  ;;  %v745_v14 = vrot.slane %v744_v9, 2  ;;  %v599_v57 = vpop.permute.xlu1 %598 }
 0x226   : > { %v2436_v40 = vmul.f32 %v2829_v49, %v565_v61  ;;  %v779_v56 = vsel %vm326_vm0, %v777_v11, 0.0  ;;  %v517_v3 = vadd.f32 %v516_v10, %v515_v29  ;;  %v524_v5 = vadd.f32 %v523_v53, %v522_v45 }
 0x227   : > { %v2441_v17 = vmul.f32 %v2830_v6, %v572_v63  ;;  %v697_v23 = vadd.f32 %v696_v46, %v695_v58  ;;  %v704_v32 = vadd.f32 %v703_v43, %v702_v55  ;;  %v2831_v0 = vrot.slane %v2270_v38, %v2127_v44 }
 0x228   : > { %v2832_v18 = vrot.slane %v2270_v38, %v2239_v12  ;;  %v739_v13 = vadd.f32 %v738_v28, %v737_v60  ;;  %v786_v61 = vsel %vm326_vm0, %v778_v21, 0.0  ;;  %v518_v63 = vrot.slane %v517_v3, 2 }
 0x229   : > { %v498_v27 = vmul.f32 %v2831_v0, %v477_v59  ;;  %v525_v4 = vrot.slane %v524_v5, 2  ;;  %v780_v29 = vrot.slane %v779_v56, 4  ;;  %v821_v58 = vmul.f32 %v819_v1, %v2158_v20 }
 0x22a   : > { %v499_v16 = vmul.f32 %v2832_v18, %v484_v39  ;;  %v746_v55 = vadd.f32 %v745_v14, %v744_v9  ;;  %v519_v45 = vadd.f32 %v518_v63, %v517_v3  ;;  %v822_v43 = vmul.f32 %v819_v1, %v2156_v19 }
 0x22b   : > { %v500_v33 = vadd.f32 %v498_v27, %v456_v31  ;;  %v526_v46 = vadd.f32 %v525_v4, %v524_v5  ;;  %v2833_v38 = vrot.slane %v2254_v26, %v2127_v44  ;;  %v787_v60 = vrot.slane %v786_v61, 4  ;;  %v863_v31 = vpop.permute.xlu0 %862 }
 0x22c   : > { %v501_v11 = vadd.f32 %v499_v16, %v457_v34  ;;  %v601_v28 = vmul.f32 %v599_v57, %v2120_v37  ;;  %v602_v21 = vmul.f32 %v599_v57, %v2118_v36  ;;  %v2834_v34 = vrot.slane %v2254_v26, %v2239_v12  ;;  %v643_v16 = vpop.permute.xlu1 %642 }
 0x22d   : > { %v2456_v22 = vmul.f32 %v2833_v38, %v697_v23  ;;  %v520_v9 = vrot.slane %v519_v45, 1  ;;  %v527_v10 = vrot.slane %v526_v46, 1  ;;  %v823_v19 = vsel %vm326_vm0, %v821_v58, 0.0 }
 0x22e   : > { %v2463_v20 = vmul.f32 %v2834_v34, %v704_v32  ;;  %v740_v53 = vrot.slane %v739_v13, 1  ;;  %v781_v49 = vadd.f32 %v780_v29, %v779_v56  ;;  %v603_v6 = vsel %vm326_vm0, %v601_v28, 0.0 }
 0x22f   : > { %v610_v59 = vsel %vm326_vm0, %v602_v21, 0.0  ;;  %v747_v39 = vrot.slane %v746_v55, 1  ;;  %v521_v37 = vadd.f32 %v520_v9, %v519_v45  ;;  %v528_v1 = vadd.f32 %v527_v10, %v526_v46  ;;  %v982_v29 = vpop.permute.xlu0 %981 }
 0x230   : > { %v830_v36 = vsel %vm326_vm0, %v822_v43, 0.0  ;;  %v788_v14 = vadd.f32 %v787_v60, %v786_v61  ;;  %v824_v3 = vrot.slane %v823_v19, 4  ;;  %v604_v26 = vrot.slane %v603_v6, 4 }
 0x231   : > { %v611_v5 = vrot.slane %v610_v59, 4  ;;  %v2835_v23 = vrot.slane %v2282_v50, %v2127_v44  ;;  %v2836_v56 = vrot.slane %v2282_v50, %v2239_v12  ;;  %v865_v27 = vmul.f32 %v863_v31, %v2163_v25 }
 0x232   : > { %v866_v18 = vmul.f32 %v863_v31, %v2161_v24  ;;  %v782_v63 = vrot.slane %v781_v49, 2  ;;  %v831_v4 = vrot.slane %v830_v36, 4  ;;  %v605_v57 = vadd.f32 %v604_v26, %v603_v6 }
 0x233   : > { %v542_v32 = vmul.f32 %v2835_v23, %v521_v37  ;;  %v543_v0 = vmul.f32 %v2836_v56, %v528_v1  ;;  %v612_v61 = vadd.f32 %v611_v5, %v610_v59  ;;  %v867_v46 = vsel %vm326_vm0, %v865_v27, 0.0  ;;  %v2483_v1 = vpop.permute.xlu1 %1239 }
 0x234   : > { %v874_v43 = vsel %vm326_vm0, %v866_v18, 0.0  ;;  %v789_v38 = vrot.slane %v788_v14, 2  ;;  %v825_v60 = vadd.f32 %v824_v3, %v823_v19  ;;  %v606_v50 = vrot.slane %v605_v57, 2 }
 0x235   : > { %v544_v58 = vadd.f32 %v542_v32, %v500_v33  ;;  %v545_v45 = vadd.f32 %v543_v0, %v501_v11  ;;  %v613_v28 = vrot.slane %v612_v61, 2  ;;  %v868_v21 = vrot.slane %v867_v46, 4 }
 0x236   : > { %v875_v31 = vrot.slane %v874_v43, 4  ;;  %v741_v34 = vadd.f32 %v740_v53, %v739_v13  ;;  %v748_v9 = vadd.f32 %v747_v39, %v746_v55  ;;  %v607_v10 = vadd.f32 %v606_v50, %v605_v57 }
 0x237   : > { %v588_v25 = vadd.f32 %v2436_v40, %v544_v58  ;;  %v589_v24 = vadd.f32 %v2441_v17, %v545_v45  ;;  %v614_v6 = vadd.f32 %v613_v28, %v612_v61  ;;  %v832_v33 = vadd.f32 %v831_v4, %v830_v36  ;;  %v2487_v17 = vpop.permute.xlu0 %1369 }
 0x238   : > { %v869_v11 = vadd.f32 %v868_v21, %v867_v46  ;;  %v645_v59 = vmul.f32 %v643_v16, %v2131_v48  ;;  %v646_v37 = vmul.f32 %v643_v16, %v2129_v47  ;;  %v783_v19 = vadd.f32 %v782_v63, %v781_v49  ;;  %v900_v46 = vpop.permute.xlu1 %899 }
 0x239   : > { %v2485_v3 = vadd.f32 %v789_v38, %v788_v14  ;;  %v608_v40 = vrot.slane %v607_v10, 1  ;;  %v615_v26 = vrot.slane %v614_v6, 1  ;;  %v826_v5 = vrot.slane %v825_v60, 2 }
 0x23a   : > { %v876_v13 = vadd.f32 %v875_v31, %v874_v43  ;;  %v647_v55 = vsel %vm326_vm0, %v645_v59, 0.0  ;;  %v654_v53 = vsel %vm326_vm0, %v646_v37, 0.0  ;;  %v2837_v48 = vrot.slane %v2268_v8, %v2127_v44 }
 0x23b   : > { %v2838_v47 = vrot.slane %v2268_v8, %v2239_v12  ;;  %v609_v36 = vadd.f32 %v608_v40, %v607_v10  ;;  %v616_v14 = vadd.f32 %v615_v26, %v614_v6  ;;  %v833_v23 = vrot.slane %v832_v33, 2  ;;  %v1114_v21 = vpop.permute.xlu0 %1113  ;;  %v1743_v26 = vld [vmem:[%s2034_s26] sm:$0xff]  ;;  %s1457_s26 = sld [smem:[#allocation3]] }
 0x23c   : > { %v2494_v39 = vmul.f32 %v2837_v48, %v741_v34  ;;  %v870_v32 = vrot.slane %v869_v11, 2  ;;  %v648_v56 = vrot.slane %v647_v55, 4  ;;  %v655_v0 = vrot.slane %v654_v53, 4 }
 0x23d   : > { %v2499_v49 = vmul.f32 %v2838_v47, %v748_v9  ;;  %v784_v27 = vrot.slane %v783_v19, 1  ;;  %v791_v18 = vrot.slane %v2485_v3, 1  ;;  %v2839_v16 = vrot.slane %v2294_v15, %v2127_v44 }
 0x23e   : > { %v2840_v4 = vrot.slane %v2294_v15, %v2239_v12  ;;  %v827_v8 = vadd.f32 %v826_v5, %v825_v60  ;;  %v877_v61 = vrot.slane %v876_v13, 2  ;;  %v649_v58 = vadd.f32 %v648_v56, %v647_v55 }
 0x23f   : > { %v630_v63 = vmul.f32 %v2839_v16, %v609_v36  ;;  %v656_v45 = vadd.f32 %v655_v0, %v654_v53  ;;  %v984_v50 = vmul.f32 %v982_v29, %v2252_v62  ;;  %v985_v28 = vmul.f32 %v982_v29, %v2260_v30  ;;  %v938_v53 = vpop.permute.xlu1 %937  ;;  %v2841_v16 = vld [vmem:[#allocation26_spill] sm:$0xff] }
 0x240   : > { %v631_v57 = vmul.f32 %v2840_v4, %v616_v14  ;;  %v834_v31 = vadd.f32 %v833_v23, %v832_v33  ;;  %v871_v34 = vadd.f32 %v870_v32, %v869_v11  ;;  %v650_v9 = vrot.slane %v649_v58, 2 }
 0x241   : > { %v632_v43 = vadd.f32 %v630_v63, %v588_v25  ;;  %v657_v10 = vrot.slane %v656_v45, 2  ;;  %v785_v6 = vadd.f32 %v784_v27, %v783_v19  ;;  %v986_v15 = vsel %vm326_vm0, %v984_v50, 0.0  ;;  %v2844_v50 = vld [vmem:[#allocation23_spill] sm:$0xff] }
 0x242   : > { %v633_v38 = vadd.f32 %v631_v57, %v589_v24  ;;  %v993_v60 = vsel %vm326_vm0, %v985_v28, 0.0  ;;  %v907_v59 = vrot.slane %v900_v46, %v2346_v54  ;;  %v828_v37 = vrot.slane %v827_v8, 1 }
 0x243   : > { %v651_v25 = vadd.f32 %v650_v9, %v649_v58  ;;  %v658_v24 = vadd.f32 %v657_v10, %v656_v45  ;;  %v1116_v62 = vmul.f32 %v1114_v21, %v2183_v51  ;;  %v878_v40 = vadd.f32 %v877_v61, %v876_v13 }
 0x244   : > { %v987_v30 = vrot.slane %v986_v15, 4  ;;  %v994_v29 = vrot.slane %v993_v60, 4  ;;  %v909_v33 = vmul.f32 %v1743_v26, %v907_v59  ;;  %v835_v11 = vrot.slane %v834_v31, 1 }
 0x245   : > { %v872_v5 = vrot.slane %v871_v34, 1  ;;  %v652_v55 = vrot.slane %v651_v25, 1  ;;  %v659_v19 = vrot.slane %v658_v24, 1  ;;  %v1118_v51 = vsel %vm326_vm0, %v1116_v62, 0.0 }
 0x246   : > { %v988_v48 = vadd.f32 %v987_v30, %v986_v15  ;;  %v995_v47 = vadd.f32 %v994_v29, %v993_v60  ;;  %v911_v36 = vcombine.high %v909_v33, %v909_v33  ;;  %v913_v54 = vsel %vm326_vm0, %v909_v33, 0.0 }
 0x247   : > { %v653_v14 = vadd.f32 %v652_v55, %v651_v25  ;;  %v660_v23 = vadd.f32 %v659_v19, %v658_v24  ;;  %v914_v32 = vrot.slane %v913_v54, 4  ;;  %v879_v13 = vrot.slane %v878_v40, 1  ;;  %v1026_v25 = vpop.permute.xlu1 %1025  ;;  %v2848_v19 = vld [vmem:[#allocation24_spill] sm:$0xff] }
 0x248   : > { %v989_v56 = vrot.slane %v988_v48, 2  ;;  %v920_v0 = vsel %vm326_vm0, %v911_v36, 0.0  ;;  %v1117_v27 = vmul.f32 %v1114_v21, %v2185_v52  ;;  %v2842_v63 = vrot.slane %v2841_v16, %v2127_v44 }
 0x249   : > { %v2843_v57 = vrot.slane %v2841_v16, %v2239_v12  ;;  %v996_v58 = vrot.slane %v995_v47, 2  ;;  %v921_v45 = vrot.slane %v920_v0, 4  ;;  %v792_v46 = vadd.f32 %v791_v18, %v2485_v3  ;;  %v2854_v16 = vld [vmem:[#allocation13_spill] sm:$0xff] }
 0x24a   : > { %v674_v4 = vmul.f32 %v2842_v63, %v653_v14  ;;  %v2845_v28 = vrot.slane %v2844_v50, %v2127_v44  ;;  %v915_v10 = vadd.f32 %v914_v32, %v913_v54  ;;  %v1119_v15 = vrot.slane %v1118_v51, 4 }
 0x24b   : > { %v675_v61 = vmul.f32 %v2843_v57, %v660_v23  ;;  %v829_v60 = vadd.f32 %v828_v37, %v827_v8  ;;  %v922_v59 = vadd.f32 %v921_v45, %v920_v0  ;;  %v836_v24 = vadd.f32 %v835_v11, %v834_v31 }
 0x24c   : > { %v806_v9 = vmul.f32 %v2845_v28, %v785_v6  ;;  %v676_v52 = vadd.f32 %v674_v4, %v632_v43  ;;  %v873_v62 = vadd.f32 %v872_v5, %v871_v34  ;;  %v880_v30 = vadd.f32 %v879_v13, %v878_v40 }
 0x24d   : > { %v677_v21 = vadd.f32 %v675_v61, %v633_v38  ;;  %v990_v29 = vadd.f32 %v989_v56, %v988_v48  ;;  %v997_v3 = vadd.f32 %v996_v58, %v995_v47  ;;  %v1125_v18 = vsel %vm326_vm0, %v1117_v27, 0.0  ;;  %v2847_v38 = vld [vmem:[#allocation12_spill] sm:$0xff]  ;;  %v2851_v48 = vld [vmem:[#allocation25_spill] sm:$0xff]  ;;  %v1158_v56 = vpop.permute.xlu0 %1157 }
 0x24e   : > { %v720_v26 = vadd.f32 %v2456_v22, %v676_v52  ;;  %v2846_v6 = vrot.slane %v2844_v50, %v2239_v12  ;;  %v916_v8 = vrot.slane %v915_v10, 2  ;;  %v1120_v43 = vadd.f32 %v1119_v15, %v1118_v51  ;;  %v2855_v15 = vld [vmem:[#allocation18_spill] sm:$0xff] }
 0x24f   : > { %v721_v33 = vadd.f32 %v2463_v20, %v677_v21  ;;  %v940_v37 = vmul.f32 %v938_v53, %v2847_v38  ;;  %v2849_v31 = vrot.slane %v2848_v19, %v2127_v44  ;;  %v923_v20 = vrot.slane %v922_v59, 2 }
 0x250   : > { %v807_v55 = vmul.f32 %v2846_v6, %v792_v46  ;;  %v764_v40 = vadd.f32 %v2494_v39, %v720_v26  ;;  %v2850_v11 = vrot.slane %v2848_v19, %v2239_v12  ;;  %v2852_v47 = vrot.slane %v2851_v48, %v2127_v44  ;;  %v2857_v26 = vld [vmem:[#allocation14_spill] sm:$0xff] }
 0x251   : > { %v850_v34 = vmul.f32 %v2849_v31, %v829_v60  ;;  %v765_v22 = vadd.f32 %v2499_v49, %v721_v33  ;;  %v991_v54 = vrot.slane %v990_v29, 1  ;;  %v1126_v14 = vrot.slane %v1125_v18, 4  ;;  %v2550_v49 = vpop.permute.xlu1 %1069  ;;  %v2859_v31 = vld [vmem:[#allocation15_spill] sm:$0xff] }
 0x252   : > { %v851_v5 = vmul.f32 %v2850_v11, %v836_v24  ;;  %v894_v36 = vmul.f32 %v2852_v47, %v873_v62  ;;  %v2853_v23 = vrot.slane %v2851_v48, %v2239_v12  ;;  %v998_v13 = vrot.slane %v997_v3, 1  ;;  %v2856_v62 = vld [vmem:[#allocation19_spill] sm:$0xff]  ;;  %v2860_v47 = vld [vmem:[#allocation20_spill] sm:$0xff] }
 0x253   : > { %v809_v51 = vadd.f32 %v807_v55, %v765_v22  ;;  %v808_v39 = vadd.f32 %v806_v9, %v764_v40  ;;  %v917_v0 = vadd.f32 %v916_v8, %v915_v10  ;;  %v1121_v27 = vrot.slane %v1120_v43, 2  ;;  %v1202_v8 = vpop.permute.xlu0 %1201 }
 0x254   : > { %v895_v32 = vmul.f32 %v2853_v23, %v880_v30  ;;  %v941_v63 = vmul.f32 %v938_v53, %v2854_v16  ;;  %v942_v4 = vsel %vm326_vm0, %v940_v37, 0.0  ;;  %v924_v58 = vadd.f32 %v923_v20, %v922_v59  ;;  %v2858_v59 = vld [vmem:[#allocation10_spill] sm:$0xff] }
 0x255   : > { %v852_v57 = vadd.f32 %v850_v34, %v808_v39  ;;  %v853_v61 = vadd.f32 %v851_v5, %v809_v51  ;;  %v943_v45 = vrot.slane %v942_v4, 4  ;;  %v992_v46 = vadd.f32 %v991_v54, %v990_v29  ;;  %v2562_v38 = vpop.permute.xlu1 %1281  ;;  %v2861_v54 = vld [vmem:[#allocation21_spill] sm:$0xff] }
 0x256   : > { %v2554_v50 = vadd.f32 %v1126_v14, %v1125_v18  ;;  %v949_v28 = vsel %vm326_vm0, %v941_v63, 0.0  ;;  %v1160_v9 = vmul.f32 %v1158_v56, %v2855_v15  ;;  %v918_v24 = vrot.slane %v917_v0, 1 }
 0x257   : > { %v896_v60 = vadd.f32 %v894_v36, %v852_v57  ;;  %v897_v52 = vadd.f32 %v895_v32, %v853_v61  ;;  %v944_v21 = vadd.f32 %v943_v45, %v942_v4  ;;  %v950_v10 = vrot.slane %v949_v28, 4 }
 0x258   : > { %v1161_v53 = vmul.f32 %v1158_v56, %v2856_v62  ;;  %v1162_v30 = vsel %vm326_vm0, %v1160_v9, 0.0  ;;  %v1028_v33 = vmul.f32 %v1026_v25, %v2857_v26  ;;  %vm1241_vm6 = vcmp.lt.s32.totalorder %v2858_v59, 98  ;;  %v2862_v9 = vld [vmem:[#allocation29_spill] sm:$0xff]  ;;  %v2864_v62 = vld [vmem:[#allocation27_spill] sm:$0xff] }
 0x259   : > { %v999_v29 = vadd.f32 %v998_v13, %v997_v3  ;;  %v925_v18 = vrot.slane %v924_v58, 1  ;;  %v945_v6 = vrot.slane %v944_v21, 2  ;;  %v951_v55 = vadd.f32 %v950_v10, %v949_v28 }
 0x25a   : > { %v2564_v37 = vadd.f32 %v1121_v27, %v1120_v43  ;;  %v1163_v19 = vrot.slane %v1162_v30, 4  ;;  %v1029_v34 = vmul.f32 %v1026_v25, %v2859_v31  ;;  %v1030_v40 = vsel %vm326_vm0, %v1028_v33, 0.0  ;;  %v2867_v31 = vld [vmem:[#allocation22_spill] sm:$0xff] }
 0x25b   : > { %v946_v22 = vadd.f32 %v945_v6, %v944_v21  ;;  %v952_v20 = vrot.slane %v951_v55, 2  ;;  %v1169_v11 = vsel %vm326_vm0, %v1161_v53, 0.0  ;;  %v1031_v5 = vrot.slane %v1030_v40, 4 }
 0x25c   : > { %v919_v48 = vadd.f32 %v918_v24, %v917_v0  ;;  %v1037_v3 = vsel %vm326_vm0, %v1029_v34, 0.0  ;;  %v1204_v36 = vmul.f32 %v1202_v8, %v2860_v47  ;;  %v1205_v14 = vmul.f32 %v1202_v8, %v2861_v54  ;;  %v2573_v0 = vpop.permute.xlu1 %1283  ;;  %v1246_v24 = vpop.permute.xlu0 %1245 }
 0x25d   : > { %v926_v23 = vadd.f32 %v925_v18, %v924_v58  ;;  %v947_v43 = vrot.slane %v946_v22, 1  ;;  %v953_v32 = vadd.f32 %v952_v20, %v951_v55  ;;  %v1032_v51 = vadd.f32 %v1031_v5, %v1030_v40 }
 0x25e   : > { %v1164_v13 = vadd.f32 %v1163_v19, %v1162_v30  ;;  %v1170_v25 = vrot.slane %v1169_v11, 4  ;;  %v1038_v39 = vrot.slane %v1037_v3, 4  ;;  %v1206_v56 = vsel %vm326_vm0, %v1204_v36, 0.0 }
 0x25f   : > { %v927_v27 = vadd.f32 %v919_v48, %v896_v60  ;;  %v948_v16 = vadd.f32 %v947_v43, %v946_v22  ;;  %v954_v63 = vrot.slane %v953_v32, 1  ;;  %v1033_v4 = vrot.slane %v1032_v51, 2 }
 0x260   : > { %v1128_v57 = vrot.slane %v2554_v50, 2  ;;  %v1039_v61 = vadd.f32 %v1038_v39, %v1037_v3  ;;  %v1207_v45 = vrot.slane %v1206_v56, 4  ;;  %v1213_v58 = vsel %vm326_vm0, %v1205_v14, 0.0  ;;  %v1326_v47 = vpop.permute.xlu1 %1325  ;;  %v2871_v39 = vld [vmem:[#allocation16_spill] sm:$0xff] }
 0x261   : > { %vm1285_vm7 = vcmp.lt.s32.totalorder %v2858_v59, 97  ;;  %v928_v28 = vadd.f32 %v926_v23, %v897_v52  ;;  %v955_v15 = vadd.f32 %v954_v63, %v953_v32  ;;  %v2863_v21 = vrot.slane %v2862_v9, %v2127_v44  ;;  %v2869_v32 = vld [vmem:[#allocation31_spill] sm:$0xff] }
 0x262   : > { %v1034_v60 = vadd.f32 %v1033_v4, %v1032_v51  ;;  %v2865_v53 = vrot.slane %v2864_v62, %v2127_v44  ;;  %v1165_v26 = vrot.slane %v1164_v13, 2  ;;  %v1171_v33 = vadd.f32 %v1170_v25, %v1169_v11  ;;  %v2872_v4 = vld [vmem:[#allocation17_spill] sm:$0xff] }
 0x263   : > { %v969_v10 = vmul.f32 %v2863_v21, %v948_v16  ;;  %v1040_v18 = vrot.slane %v1039_v61, 2  ;;  %v2866_v6 = vrot.slane %v2862_v9, %v2239_v12  ;;  %v1214_v19 = vrot.slane %v1213_v58, 4 }
 0x264   : > { %v1013_v30 = vmul.f32 %v2865_v53, %v992_v46  ;;  %v1035_v52 = vrot.slane %v1034_v60, 1  ;;  %vm1329_vm8 = vcmp.lt.s32.totalorder %v2858_v59, 96  ;;  %v1242_v34 = vsel %vm1241_vm6, %v2867_v31, %v2483_v1  ;;  %v1328_v53 = vpop.permute.xlu1 %1327 }
 0x265   : > { %v970_v55 = vmul.f32 %v2866_v6, %v955_v15  ;;  %v971_v8 = vadd.f32 %v969_v10, %v927_v27  ;;  %v1243_v46 = vsel %vm1241_vm6, %v2483_v1, %v2867_v31  ;;  %v1041_v40 = vadd.f32 %v1040_v18, %v1039_v61 }
 0x266   : > { %v1208_v22 = vadd.f32 %v1207_v45, %v1206_v56  ;;  %v2868_v20 = vrot.slane %v2864_v62, %v2239_v12  ;;  %v1036_v3 = vadd.f32 %v1035_v52, %v1034_v60  ;;  %v1123_v36 = vrot.slane %v2564_v37, 1 }
 0x267   : > { %v972_v5 = vadd.f32 %v970_v55, %v928_v28  ;;  %v1015_v48 = vadd.f32 %v1013_v30, %v971_v8  ;;  %v1129_v54 = vadd.f32 %v1128_v57, %v2554_v50  ;;  %v1172_v14 = vrot.slane %v1171_v33, 2 }
 0x268   : > { %v1014_v11 = vmul.f32 %v2868_v20, %v999_v29  ;;  %v1042_v23 = vrot.slane %v1041_v40, 1  ;;  %v1166_v43 = vadd.f32 %v1165_v26, %v1164_v13  ;;  %v2870_v1 = vrot.slane %v2869_v32, %v2127_v44  ;;  %v1290_v29 = vpop.permute.xlu0 %1289 }
 0x269   : > { %v1215_v25 = vadd.f32 %v1214_v19, %v1213_v58  ;;  %v1072_v56 = vmul.f32 %v2550_v49, %v2871_v39  ;;  %v1209_v63 = vrot.slane %v1208_v22, 2  ;;  %v1073_v61 = vmul.f32 %v2550_v49, %v2872_v4 }
 0x26a   : > { %v1057_v51 = vmul.f32 %v2870_v1, %v1036_v3  ;;  %v1016_v27 = vadd.f32 %v1014_v11, %v972_v5  ;;  %v1043_v16 = vadd.f32 %v1042_v23, %v1041_v40  ;;  %v1248_v13 = vmul.f32 %v1246_v24, %v1242_v34 }
 0x26b   : > { %v1074_v50 = vsel %vm326_vm0, %v1072_v56, 0.0  ;;  %v1249_v57 = vmul.f32 %v1246_v24, %v1243_v46  ;;  %v1124_v28 = vadd.f32 %v1123_v36, %v2564_v37  ;;  %v1130_v15 = vrot.slane %v1129_v54, 1 }
 0x26c   : > { %v2608_v45 = vadd.f32 %v1057_v51, %v1015_v48  ;;  %v2873_v58 = vrot.slane %v2869_v32, %v2239_v12  ;;  %v1075_v21 = vrot.slane %v1074_v50, 4  ;;  %v1167_v10 = vrot.slane %v1166_v43, 1  ;;  %v1334_v8 = vpop.permute.xlu0 %1333 }
 0x26d   : > { %v1173_v60 = vadd.f32 %v1172_v14, %v1171_v33  ;;  %v1081_v62 = vsel %vm326_vm0, %v1073_v61, 0.0  ;;  %v1286_v49 = vsel %vm1285_vm7, %v2562_v38, %v2573_v0  ;;  %v1250_v37 = vsel %vm326_vm0, %v1248_v13, 0.0 }
 0x26e   : > { %v1058_v9 = vmul.f32 %v2873_v58, %v1043_v16  ;;  %v1076_v24 = vadd.f32 %v1075_v21, %v1074_v50  ;;  %v1257_v26 = vsel %vm326_vm0, %v1249_v57, 0.0  ;;  %v1210_v18 = vadd.f32 %v1209_v63, %v1208_v22 }
 0x26f   : > { %v1216_v6 = vrot.slane %v1215_v25, 2  ;;  %v1082_v55 = vrot.slane %v1081_v62, 4  ;;  %v1287_v33 = vsel %vm1285_vm7, %v2573_v0, %v2562_v38  ;;  %v1292_v19 = vmul.f32 %v1290_v29, %v1286_v49 }
 0x270   : > { %v2620_v30 = vadd.f32 %v1058_v9, %v1016_v27  ;;  %v1077_v52 = vrot.slane %v1076_v24, 2  ;;  %v1293_v31 = vmul.f32 %v1290_v29, %v1287_v33  ;;  %v1330_v34 = vsel %vm1329_vm8, %v1326_v47, %v1328_v53  ;;  %v1378_v27 = vpop.permute.xlu0 %1377  ;;  %v2874_v9 = vld [vmem:[#allocation33_spill] sm:$0xff]  ;;  %v1372_v33 = vpop.permute.xlu1 %1371 }
 0x271   : > { %v1083_v46 = vadd.f32 %v1082_v55, %v1081_v62  ;;  %v1251_v40 = vrot.slane %v1250_v37, 4  ;;  %v1258_v20 = vrot.slane %v1257_v26, 4  ;;  %v1331_v22 = vsel %vm1329_vm8, %v1328_v53, %v1326_v47 }
 0x272   : > { %v1078_v11 = vadd.f32 %v1077_v52, %v1076_v24  ;;  %v1294_v5 = vsel %vm326_vm0, %v1292_v19, 0.0  ;;  %v1301_v48 = vsel %vm326_vm0, %v1293_v31, 0.0  ;;  %v1336_v3 = vmul.f32 %v1334_v8, %v1330_v34 }
 0x273   : > { %vm1373_vm9 = vcmp.lt.s32.totalorder %v2858_v59, 95  ;;  %v1174_v38 = vrot.slane %v1173_v60, 1  ;;  %v1211_v0 = vrot.slane %v1210_v18, 1  ;;  %v1217_v36 = vadd.f32 %v1216_v6, %v1215_v25 }
 0x274   : > { %v1084_v14 = vrot.slane %v1083_v46, 2  ;;  %v1079_v23 = vrot.slane %v1078_v11, 1  ;;  %v1295_v32 = vrot.slane %v1294_v5, 4  ;;  %v1337_v1 = vmul.f32 %v1334_v8, %v1331_v22  ;;  %v2879_v8 = vld [vmem:[#allocation30_spill] sm:$0xff] }
 0x275   : > { %v1338_v51 = vsel %vm326_vm0, %v1336_v3, 0.0  ;;  %v1131_v39 = vadd.f32 %v1130_v15, %v1129_v54  ;;  %v1252_v47 = vadd.f32 %v1251_v40, %v1250_v37  ;;  %v1302_v29 = vrot.slane %v1301_v48, 4  ;;  %v2876_v15 = vld [vmem:[#allocation28_spill] sm:$0xff] }
 0x276   : > { %v1085_v56 = vadd.f32 %v1084_v14, %v1083_v46  ;;  %v1080_v16 = vadd.f32 %v1079_v23, %v1078_v11  ;;  %v1259_v63 = vadd.f32 %v1258_v20, %v1257_v26  ;;  %v1339_v4 = vrot.slane %v1338_v51, 4  ;;  %v1422_v20 = vpop.permute.xlu0 %1421 }
 0x277   : > { %v1345_v61 = vsel %vm326_vm0, %v1337_v1, 0.0  ;;  %v1168_v50 = vadd.f32 %v1167_v10, %v1166_v43  ;;  %v1175_v13 = vadd.f32 %v1174_v38, %v1173_v60  ;;  %v1218_v57 = vrot.slane %v1217_v36, 1 }
 0x278   : > { %v1086_v25 = vrot.slane %v1085_v56, 1  ;;  %v1212_v58 = vadd.f32 %v1211_v0, %v1210_v18  ;;  %v2875_v21 = vrot.slane %v2874_v9, %v2127_v44  ;;  %v1296_v49 = vadd.f32 %v1295_v32, %v1294_v5 }
 0x279   : > { %v1346_v54 = vrot.slane %v1345_v61, 4  ;;  %v2877_v53 = vrot.slane %v2876_v15, %v2127_v44  ;;  %v2878_v37 = vrot.slane %v2876_v15, %v2239_v12  ;;  %v1303_v43 = vadd.f32 %v1302_v29, %v1301_v48 }
 0x27a   : > { %v1101_v62 = vmul.f32 %v2875_v21, %v1080_v16  ;;  %v1087_v6 = vadd.f32 %v1086_v25, %v1085_v56  ;;  %v1253_v60 = vrot.slane %v1252_v47, 2  ;;  %v1260_v18 = vrot.slane %v1259_v63, 2  ;;  %v2670_v25 = vld [vmem:[#allocation4 + $0x2e] sm:$0x3] }
 0x27b   : > { %v1145_v24 = vmul.f32 %v2877_v53, %v1124_v28  ;;  %v1146_v26 = vmul.f32 %v2878_v37, %v1131_v39  ;;  %v1340_v55 = vadd.f32 %v1339_v4, %v1338_v51  ;;  %v2880_v52 = vrot.slane %v2879_v8, %v2127_v44 }
 0x27c   : > { %v1103_v10 = vadd.f32 %v1101_v62, %v2608_v45  ;;  %v2881_v31 = vrot.slane %v2879_v8, %v2239_v12  ;;  %v2882_v34 = vrot.slane %v2874_v9, %v2239_v12  ;;  %v1347_v40 = vadd.f32 %v1346_v54, %v1345_v61  ;;  %v2883_v45 = vld [vmem:[#allocation32_spill] sm:$0xff] }
 0x27d   : > { %v1189_v19 = vmul.f32 %v2880_v52, %v1168_v50  ;;  %v1219_v22 = vadd.f32 %v1218_v57, %v1217_v36  ;;  %v2884_v11 = vrot.slane %v2883_v45, %v2127_v44  ;;  %v1297_v3 = vrot.slane %v1296_v49, 2 }
 0x27e   : > { %v1190_v28 = vmul.f32 %v2881_v31, %v1175_v13  ;;  %v1102_v46 = vmul.f32 %v2882_v34, %v1087_v6  ;;  %v1147_v48 = vadd.f32 %v1145_v24, %v1103_v10  ;;  %v1304_v0 = vrot.slane %v1303_v43, 2 }
 0x27f   : > { %v1233_v5 = vmul.f32 %v2884_v11, %v1212_v58  ;;  %v1374_v14 = vsel %vm1373_vm9, %v2487_v17, %v1372_v33  ;;  %v1375_v23 = vsel %vm1373_vm9, %v1372_v33, %v2487_v17  ;;  %v1254_v1 = vadd.f32 %v1253_v60, %v1252_v47  ;;  %v1416_v58 = vpop.permute.xlu1 %1415 }
 0x280   : > { %v1104_v38 = vadd.f32 %v1102_v46, %v2620_v30  ;;  %v1191_v32 = vadd.f32 %v1189_v19, %v1147_v48  ;;  %v1261_v36 = vadd.f32 %v1260_v18, %v1259_v63  ;;  %v1341_v51 = vrot.slane %v1340_v55, 2  ;;  %v1414_v63 = vpop.permute.xlu0 %1413 }
 0x281   : > { %v1348_v56 = vrot.slane %v1347_v40, 2  ;;  %v1380_v29 = vmul.f32 %v1378_v27, %v1374_v14  ;;  %v1381_v16 = vmul.f32 %v1378_v27, %v1375_v23  ;;  %v2885_v30 = vrot.slane %v2883_v45, %v2239_v12 }
 0x282   : > { %v1148_v39 = vadd.f32 %v1146_v26, %v1104_v38  ;;  %v1235_v61 = vadd.f32 %v1233_v5, %v1191_v32  ;;  %v1298_v50 = vadd.f32 %v1297_v3, %v1296_v49  ;;  %vm1417_vm10 = vcmp.lt.s32.totalorder %v2858_v59, 94  ;;  %v2886_v3 = vld [vmem:[#allocation34_spill] sm:$0xff] }
 0x283   : > { %v1234_v4 = vmul.f32 %v2885_v30, %v1219_v22  ;;  %v1305_v57 = vadd.f32 %v1304_v0, %v1303_v43  ;;  %v1382_v17 = vsel %vm326_vm0, %v1380_v29, 0.0  ;;  %v1389_v47 = vsel %vm326_vm0, %v1381_v16, 0.0 }
 0x284   : > { %v1192_v13 = vadd.f32 %v1190_v28, %v1148_v39  ;;  %v1255_v9 = vrot.slane %v1254_v1, 1  ;;  %v1362_v27 = vrot.slane %v2421_v42, %v2239_v12  ;;  %v1342_v21 = vadd.f32 %v1341_v51, %v1340_v55 }
 0x285   : > { %v1383_v62 = vrot.slane %v1382_v17, 4  ;;  %v1262_v49 = vrot.slane %v1261_v36, 1  ;;  %v1349_v15 = vadd.f32 %v1348_v56, %v1347_v40  ;;  %v1390_v53 = vrot.slane %v1389_v47, 4 }
 0x286   : > { %v1236_v54 = vadd.f32 %v1234_v4, %v1192_v13  ;;  %v1299_v24 = vrot.slane %v1298_v50, 1  ;;  %v1402_v37 = vrot.slane %v2670_v25, %v2127_v44  ;;  %v1418_v6 = vsel %vm1417_vm10, %v1414_v63, %v1416_v58 }
 0x287   : > { %v1384_v26 = vadd.f32 %v1383_v62, %v1382_v17  ;;  %v1306_v43 = vrot.slane %v1305_v57, 1  ;;  %v1391_v10 = vadd.f32 %v1390_v53, %v1389_v47  ;;  %v1419_v60 = vsel %vm1417_vm10, %v1416_v58, %v1414_v63 }
 0x288   : > { %v1424_v18 = vmul.f32 %v1422_v20, %v1418_v6  ;;  %v1256_v55 = vadd.f32 %v1255_v9, %v1254_v1  ;;  %v1343_v33 = vrot.slane %v1342_v21, 1  ;;  %v1425_v52 = vmul.f32 %v1422_v20, %v1419_v60 }
 0x289   : > { %v1385_v8 = vrot.slane %v1384_v26, 2  ;;  %v1263_v19 = vadd.f32 %v1262_v49, %v1261_v36  ;;  %v1350_v31 = vrot.slane %v1349_v15, 1  ;;  %v1392_v28 = vrot.slane %v1391_v10, 2 }
 0x28a   : > { %v1426_v34 = vsel %vm326_vm0, %v1424_v18, 0.0  ;;  %v1300_v46 = vadd.f32 %v1299_v24, %v1298_v50  ;;  %v1433_v45 = vsel %vm326_vm0, %v1425_v52, 0.0  ;;  %v1307_v11 = vadd.f32 %v1306_v43, %v1305_v57  ;;  %v1441_v57 = vld [vmem:[#allocation4 + $0x30] sm:$0x3] }
 0x28b   : > { %v1386_v40 = vadd.f32 %v1385_v8, %v1384_v26  ;;  %v1427_v22 = vrot.slane %v1426_v34, 4  ;;  %v1406_v59 = vrot.slane %v2670_v25, %v2239_v12  ;;  %v1393_v5 = vadd.f32 %v1392_v28, %v1391_v10 }
 0x28c   : > { %v1434_v48 = vrot.slane %v1433_v45, 4  ;;  %v2887_v38 = vrot.slane %v2886_v3, %v2127_v44  ;;  %v1344_v0 = vadd.f32 %v1343_v33, %v1342_v21  ;;  %v2888_v32 = vrot.slane %v2886_v3, %v2239_v12 }
 0x28d   : > { %v1387_v14 = vrot.slane %v1386_v40, 1  ;;  %v1428_v23 = vadd.f32 %v1427_v22, %v1426_v34  ;;  %v1351_v36 = vadd.f32 %v1350_v31, %v1349_v15  ;;  %v1394_v51 = vrot.slane %v1393_v5, 1  ;;  %v2889_v34 = vld [vmem:[#allocation11_spill] sm:$0xff] }
 0x28e   : > { %v1277_v20 = vmul.f32 %v2887_v38, %v1256_v55  ;;  %v1278_v1 = vmul.f32 %v2888_v32, %v1263_v19  ;;  %v1435_v39 = vadd.f32 %v1434_v48, %v1433_v45  ;;  %v1321_v29 = vmul.f32 %v1314_v35, %v1300_v46 }
 0x28f   : > { %v1388_v16 = vadd.f32 %v1387_v14, %v1386_v40  ;;  %v1429_v30 = vrot.slane %v1428_v23, 2  ;;  %v1322_v50 = vmul.f32 %v1318_v2, %v1307_v11  ;;  %v1395_v13 = vadd.f32 %v1394_v51, %v1393_v5 }
 0x290   : > { %v1279_v56 = vadd.f32 %v1277_v20, %v1235_v61  ;;  %v1280_v4 = vadd.f32 %v1278_v1, %v1236_v54  ;;  %v1436_v25 = vrot.slane %v1435_v39, 2  ;;  %v1365_v17 = vmul.f32 %v1358_v7, %v1344_v0 }
 0x291   : > { %v1430_v61 = vadd.f32 %v1429_v30, %v1428_v23  ;;  %v1366_v47 = vmul.f32 %v1362_v27, %v1351_v36  ;;  %v1409_v35 = vmul.f32 %v1402_v37, %v1388_v16  ;;  %v1446_v9 = vrot.slane %v1441_v57, %v2127_v44 }
 0x292   : > { %v1437_v63 = vadd.f32 %v1436_v25, %v1435_v39  ;;  %v1323_v58 = vadd.f32 %v1321_v29, %v1279_v56  ;;  %v1324_v62 = vadd.f32 %v1322_v50, %v1280_v4  ;;  %v1410_v54 = vmul.f32 %v1406_v59, %v1395_v13 }
 0x293   : > { %v1431_v21 = vrot.slane %v1430_v61, 1  ;;  %v1450_v41 = vrot.slane %v1441_v57, %v2239_v12  ;;  %v1458_v6 = vstv %s1457_s26  ;;  %v1893_v52 = vmov 1966171168  }
 0x294   : > { %v1438_v2 = vrot.slane %v1437_v63, 1  ;;  %v1367_v49 = vadd.f32 %v1365_v17, %v1323_v58  ;;  %v1368_v53 = vadd.f32 %v1366_v47, %v1324_v62  ;;  %v1477_v19 = vunpack.c.l.s4 %v1893_v52 }
 0x295   : > { %v1432_v15 = vadd.f32 %v1431_v21, %v1430_v61  ;;  %v2890_v11 = vlaneseq }
 0x296   : > { %v1439_v24 = vadd.f32 %v1438_v2, %v1437_v63  ;;  %v1411_v26 = vadd.f32 %v1409_v35, %v1367_v49  ;;  %v1412_v7 = vadd.f32 %v1410_v54, %v1368_v53  ;;  %v1478_v31 = vunpack.c.0.s8 %v1477_v19 }
 0x297   : > { %v1453_v42 = vmul.f32 %v1446_v9, %v1432_v15  ;;  %vm1493_vm0 = vcmp.lt.s32.totalorder %v2890_v11, 256 }
 0x298   : > { %v1454_v27 = vmul.f32 %v1450_v41, %v1439_v24  ;;  %v1481_v46 = vsub.s32 %v1478_v31, %v2889_v34 }
 0x299   : > { %v1455_v43 = vadd.f32 %v1453_v42, %v1411_v26 }
 0x29a   : > { %v1456_v37 = vadd.f32 %v1454_v27, %v1412_v7 }
 0x29b   : > { %v1459_v10 = vadd.f32 %v1458_v6, %v1455_v43 }
 0x29c   : > { %v1460_v44 = vadd.f32 %v1458_v6, %v1456_v37 }
 0x29d   : > { %v1592_v60 = vmul.f32 -1.442695, %v1459_v10 }
 0x29e   : > { %v1593_v18 = vmul.f32 -1.442695, %v1460_v44 }
 0x29f   : > { %1735 = vpow2.f32 %v1592_v60 }
 0x2a0   : > { %1737 = vpow2.f32 %v1593_v18 }
 0x2a9   : > { %v1736_v12 = vpop.eup %1735 }
 0x2aa   : > { %v1738_v55 = vpop.eup %1737  ;;  %v1467_v33 = vadd.f32 1.0, %v1736_v12 }
 0x2ab   : > { %v1468_v8 = vadd.f32 1.0, %v1738_v55 }
 0x2ac   : > { %1739 = vrcp.f32 %v1467_v33 }
 0x2ad   : > { %1741 = vrcp.f32 %v1468_v8 }
 0x2b6   : > { %v1740_v28 = vpop.eup %1739 }
 0x2b7   : > { %v1742_v40 = vpop.eup %1741 }
 0x2b8   : > { %v1475_v22 = vcombine.low %v1740_v28, %v1742_v40 }
 0x2ba   : > { %v1482_v45 = vrot.slane %v1475_v22, %v1481_v46 }
 0x2bc   : > { %v1489_v59 = vrot.slane %v1482_v45, %v1481_v46 }
 0x2be   : > { %1495 = vst.msk [vmem:[%s316_s14] sm:$0x3] %vm1493_vm0, %v1489_v59 }
 0x2bf   : > { %1785 = shalt.err (!%p1782_p7)
}
 0x2c0   : > { %s1786_s27 = scalar_lea.hbm %s2710_s24, 32  ;;  %s1790_s29 = scalar_lea.hbm %s2760_s8, 64 }
 0x2c1   : > { %p1787_p8 = scmp.ne.s32.totalorder %s2710_s24, %s1786_s27  ;;  %p1791_p1 = scmp.lt.u32.totalorder %s2710_s24, %s2760_s8 }
 0x2c2   : > { %p1792_p0 = scmp.lt.u32.totalorder %s1790_s29, %s1786_s27  ;;  %p1794_p6 = scmp.lt.u32.totalorder %s1786_s27, %s2710_s24 }
 0x2c3   : > { %p1788_p11 = pnand %p1787_p8, %p2891_p9 }
 0x2c4   : > { %p1793_p5 = por %p1792_p0, %p1791_p1 }
 0x2c5   : > { %p1789_p13 = pneg %p1788_p11 }
 0x2c6   : > { %p1795_p10 = por %p1794_p6, %p1793_p5 }
 0x2c8   : > { %p1796_p12 = pnand %p1795_p10, %p1789_p13 }
 0x2ca   : > { %1799 = shalt.err (!%p1796_p12)
}
 0x2cb   : > { %1605 = dma.vmem_to_hbm [thread:$0]  (%p2891_p9), %s2712_s15, 32, %s2710_s24, %s1497_s25  }
 0x2cc PF: > { %p1617_p2 = scmp.ge.s32.totalorder %s1838_s12, 2  ;;  %s1523_s14 = sand.u32 1, %s1826_s9  }
 0x2cd   : > { %p2892_p3 = scmp.ne.s32.totalorder %s2794_s18, 0  ;;  %s1524_s20 = scalar_lea.sflag [#allocation6], %s1523_s14 }
 0x2cf   : > { %p1612_p4 = pnand %p1617_p2, %p2892_p3 }
 0x2d1   : > { %1821 = dma.done.wait (!%p1612_p4), %s1524_s20, 32  }
 0x2d2   : > { %1823 = vsyncadd (!%p1612_p4), %s1524_s20, 4294967264  ;;  %p22_p7 = scmp.ge.s32.totalorder %s1971_s13, 4   ;;  %s2893_s9 = smov %s1830_s10 }
 0x2d3   : > { %s2894_s10 = smov %s1834_s11  ;;  %s2895_s11 = smov %s1982_s16 }
 0x2d4   : > { %s2896_s12 = smov %s1971_s13  ;;  %24 = sbr.rel (!%p22_p7) target bundleno = 7 (0x7), region = 115 }
 0x2db   :  { %1529 = vsyncpa [#allocation5], 1 }
 0x2dc   :  { %1531 = vsyncpa [#allocation5 + $0x1], 1 }
 0x2dd   :  { %1532 = vsyncpa [#allocation6], 1 }
 0x2de   :  { %1534 = vsyncpa [#allocation6 + $0x1], 1 }

</bundles_post_ra>
